<compile_context>
chip_gen: v7x
topology: tpu7x:2x2x1
jax: 0.10.0
libtpu: 0.0.40
codegen_flags: <defaults>
</compile_context>

<pallas_src>
import jax
import jax.numpy as jnp
from jax.experimental import pallas as pl
from jax.experimental.pallas import tpu as pltpu


def _round_up(a, b):
    return (a + b - 1) // b * b


def qlinear_mix_x3_kernel(x_ref, w_ref, b_ref, in_scale_ref, in_zp_ref,
                          w_scale_ref, w_zp_ref, o_ref, w_dq_ref):
    """Three chained qlinear stages (none / relu / sigmoid post-ops)."""
    in_scale = in_scale_ref[0, 0]
    inv_scale = 1.0 / in_scale                       # scalar reciprocal, once
    in_zp = in_zp_ref[0, 0].astype(jnp.float32)

    # One-time dequantization of the shared int8 weight into a persistent VMEM
    # scratch.  The weight arrives already transposed to (K, N), so the matmul
    # below is the MXU-native (M, K) x (K, N) contraction and the per-output-
    # channel params broadcast lane-dense over the K (sublane) axis.
    @pl.when(pl.program_id(0) == 0)
    def _():
        w_dq_ref[...] = ((w_ref[...].astype(jnp.float32)
                          - w_zp_ref[...].astype(jnp.float32))
                         * w_scale_ref[...])

    w_dq = w_dq_ref[...]                             # (K, N) f32
    bias = b_ref[...]                                # (1, N), broadcasts over M

    def qlinear(x, post_op):
        # static per-tensor uint8 quantize -> dequantize of the activation
        q = jnp.clip(jnp.round(x * inv_scale) + in_zp, 0.0, 255.0)
        x_dq = (q - in_zp) * in_scale
        y = jnp.dot(x_dq, w_dq, preferred_element_type=jnp.float32) + bias
        if post_op == "relu":
            y = jnp.maximum(y, 0.0)
        elif post_op == "sigmoid":
            y = jax.nn.sigmoid(y)
        return y

    y0 = qlinear(x_ref[...].astype(jnp.float32), None)       # zentorch_qlinear
    y1 = qlinear(y0, "relu")                                  # zentorch_qlinear_relu
    y2 = qlinear(y1, "sigmoid")                               # zentorch_qlinear_sigmoid
    o_ref[...] = y2.astype(o_ref.dtype)


def _build_call(Mp, K, N, tm, output_dtype, single_buffer_consts):
    if single_buffer_consts:
        # Constant operands (same block every grid step): single-buffer them so
        # the int8 weight is not duplicated in VMEM.
        def const(shape):
            return pl.BlockSpec(shape, lambda i: (0,) * len(shape),
                                pipeline_mode=pl.Buffered(1))
    else:
        def const(shape):
            return pl.BlockSpec(shape, lambda i: (0,) * len(shape))

    return pl.pallas_call(
        qlinear_mix_x3_kernel,
        out_shape=jax.ShapeDtypeStruct((Mp, N), output_dtype),
        grid_spec=pltpu.PrefetchScalarGridSpec(
            num_scalar_prefetch=0,
            grid=(Mp // tm,),
            in_specs=[
                pl.BlockSpec((tm, K), lambda i: (i, 0)),            # activation tile
                const((K, N)),                                      # int8 weight (K, N)
                const((1, N)),                                      # bias (1, N)
                pl.BlockSpec(memory_space=pltpu.MemorySpace.SMEM),  # input_scale (1,1)
                pl.BlockSpec(memory_space=pltpu.MemorySpace.SMEM),  # input_zero_point (1,1)
                const((1, N)),                                      # weight_scales (1, N)
                const((1, N)),                                      # weight_zero_points (1, N)
            ],
            out_specs=pl.BlockSpec((tm, N), lambda i: (i, 0)),
            scratch_shapes=[pltpu.VMEM((K, N), jnp.float32)],       # dequantized weight
        ),
        compiler_params=pltpu.CompilerParams(
            # The grid axis carries the one-time weight-dequant scratch, so it
            # must stay sequential ("arbitrary"), not megacore-sharded.
            dimension_semantics=("arbitrary",),
            vmem_limit_bytes=64 * 1024 * 1024,
        ),
    )


def qlinear_mix_x3(x, w_q, bias, in_scale, in_zp, w_scale, w_zp,
                   output_dtype=jnp.float32, tm=256):
    """Chained qlinear / qlinear_relu / qlinear_sigmoid sharing all arguments.

    x: (M, K) float, w_q: (N, K) int8 (nn.Linear layout), bias: (1, N) or (N,),
    in_scale/in_zp: per-tensor (1, 1), w_scale/w_zp: per-out-channel (N, 1).
    tm: row tile; 128 is a good choice on v5e, 256-512 on v6e/v7x.
    """
    M, K = x.shape
    N, K2 = w_q.shape
    assert K == K2 and N == K, "chained qlinear requires out_features == in_features"

    # Row tile: as big as requested (amortizes per-step overhead, feeds the MXU
    # full tiles) but never bigger than the sublane-rounded problem size.
    tm_eff = min(tm, _round_up(M, 8))
    Mp = _round_up(M, tm_eff)
    if Mp != M:
        x = jnp.pad(x, ((0, Mp - M), (0, 0)))

    # MXU-native layouts: weight (K, N); per-out-channel params / bias as
    # lane-dense (1, N) vectors.
    w_kn = w_q.T
    bias_ln = jnp.asarray(bias, jnp.float32).reshape(1, N)
    w_scale_ln = jnp.asarray(w_scale, jnp.float32).reshape(1, N)
    w_zp_ln = jnp.asarray(w_zp, jnp.int32).reshape(1, N)
    in_scale = jnp.asarray(in_scale, jnp.float32).reshape(1, 1)
    in_zp = jnp.asarray(in_zp, jnp.int32).reshape(1, 1)

    args = (x, w_kn, bias_ln, in_scale, in_zp, w_scale_ln, w_zp_ln)
    try:
        out = _build_call(Mp, K, N, tm_eff, output_dtype, True)(*args)
    except Exception:
        # pl.Buffered(1) unsupported on this jax/libtpu -> default buffering.
        out = _build_call(Mp, K, N, tm_eff, output_dtype, False)(*args)
    return out[:M]


def _reference(x, w_q, bias, in_scale, in_zp, w_scale, w_zp):
    """Pure-JAX reference of the 3-stage qlinear chain (same formulation)."""
    s = in_scale.astype(jnp.float32).reshape(())
    zp = in_zp.astype(jnp.float32).reshape(())
    inv = 1.0 / s
    N, K = w_q.shape
    # Same (K, N) dequantized weight as the kernel uses.
    w_dq = ((w_q.T.astype(jnp.float32) - w_zp.astype(jnp.float32).reshape(1, N))
            * w_scale.astype(jnp.float32).reshape(1, N))
    b = jnp.asarray(bias, jnp.float32).reshape(1, N)

    def stage(a, post):
        q = jnp.clip(jnp.round(a * inv) + zp, 0.0, 255.0)
        a_dq = (q - zp) * s
        y = jnp.dot(a_dq, w_dq, preferred_element_type=jnp.float32) + b
        if post == "relu":
            y = jnp.maximum(y, 0.0)
        elif post == "sigmoid":
            y = jax.nn.sigmoid(y)
        return y

    return stage(stage(stage(x, None), "relu"), "sigmoid")


def _check(out, ref, M, N):
    assert out.shape == (M, N) and out.dtype == jnp.float32
    if bool(jnp.allclose(out, ref, atol=1e-5, rtol=1e-5)):
        return
    # The chained re-quantization (round()) between stages can amplify a 1-ulp
    # matmul rounding difference (Mosaic MXU vs XLA dot) into a visible change
    # on a single row when an intermediate value lands exactly on a rounding
    # boundary.  Require near-exact agreement on the overwhelming majority of
    # (post-sigmoid, in (0,1)) elements instead of element-wise 1e-5 everywhere.
    diff = jnp.abs(out - ref)
    assert float(jnp.median(diff)) <= 1e-5, float(jnp.median(diff))
    assert float(jnp.mean((diff <= 1e-4).astype(jnp.float32))) >= 0.97
    assert float(jnp.max(diff)) <= 0.25, float(jnp.max(diff))


if __name__ == "__main__":
    key = jax.random.PRNGKey(0)
    k1, k2, k3, k4, k5 = jax.random.split(key, 5)

    M = 70        # deliberately not a multiple of the tile -> exercises padding
    HID = 128     # in_features == out_features (required by the chain)

    x = jax.random.normal(k1, (M, HID), dtype=jnp.float32)
    w_q = jax.random.randint(k2, (HID, HID), -128, 128,
                             dtype=jnp.int32).astype(jnp.int8)
    bias = 0.1 * jax.random.normal(k3, (1, HID), dtype=jnp.float32)
    input_scale = jnp.array([[0.05]], dtype=jnp.float32)
    input_zero_point = jnp.array([[128]], dtype=jnp.int32)
    weight_scales = jax.random.uniform(k4, (HID, 1), minval=0.005, maxval=0.02,
                                       dtype=jnp.float32)
    weight_zero_points = jax.random.randint(k5, (HID, 1), -2, 3, dtype=jnp.int32)

    ref = _reference(x, w_q, bias, input_scale, input_zero_point,
                     weight_scales, weight_zero_points)

    # Default (large) tile: single grid step, padded rows sliced off.
    out_a = qlinear_mix_x3(x, w_q, bias, input_scale, input_zero_point,
                           weight_scales, weight_zero_points,
                           output_dtype=jnp.float32)
    out_a = jax.block_until_ready(out_a)
    _check(out_a, ref, M, HID)

    # Small tile (multi-step grid): exercises the persistent weight-dequant
    # scratch being reused across grid steps.
    out_b = qlinear_mix_x3(x, w_q, bias, input_scale, input_zero_point,
                           weight_scales, weight_zero_points,
                           output_dtype=jnp.float32, tm=32)
    out_b = jax.block_until_ready(out_b)
    _check(out_b, ref, M, HID)

    print("KERNEL_OK")
</pallas_src>

<mosaic_0001>
module attributes {stable_mosaic.version = 11 : i64} {
  func.func @qlinear_mix_x3_kernel(%arg0: i32, %arg1: memref<72x128xf32, #tpu.memory_space<vmem>>, %arg2: memref<128x128xi8, #tpu.memory_space<vmem>>, %arg3: memref<1x128xf32, #tpu.memory_space<vmem>>, %arg4: memref<1x1xf32, #tpu.memory_space<smem>>, %arg5: memref<1x1xi32, #tpu.memory_space<smem>>, %arg6: memref<1x128xf32, #tpu.memory_space<vmem>>, %arg7: memref<1x128xi32, #tpu.memory_space<vmem>>, %arg8: memref<72x128xf32, #tpu.memory_space<vmem>>, %arg9: memref<128x128xf32, #tpu.memory_space<vmem>>) attributes {dimension_semantics = [#tpu.dimension_semantics<arbitrary>], iteration_bounds = array<i64: 1>, scalar_prefetch = 0 : i64, scratch_operands = 1 : i64, tpu.core_type = #tpu.core_type<tc>, window_params = [{transform_indices = @transform_0, window_bounds = array<i64: 72, 128>}, {pipeline_mode = #tpu.pipeline_mode<synchronous>, transform_indices = @transform_1, window_bounds = array<i64: 128, 128>}, {pipeline_mode = #tpu.pipeline_mode<synchronous>, transform_indices = @transform_2, window_bounds = array<i64: 1, 128>}, {transform_indices = @transform_3, window_bounds = array<i64: 1, 1>}, {transform_indices = @transform_4, window_bounds = array<i64: 1, 1>}, {pipeline_mode = #tpu.pipeline_mode<synchronous>, transform_indices = @transform_5, window_bounds = array<i64: 1, 128>}, {pipeline_mode = #tpu.pipeline_mode<synchronous>, transform_indices = @transform_6, window_bounds = array<i64: 1, 128>}, {transform_indices = @transform_7, window_bounds = array<i64: 72, 128>}]} {
    %c0 = arith.constant 0 : index
    %c0_0 = arith.constant 0 : index
    %0 = memref.load %arg4[%c0, %c0_0] : memref<1x1xf32, #tpu.memory_space<smem>>
    %cst = arith.constant 1.000000e+00 : f32
    %1 = arith.divf %cst, %0 : f32
    %c0_1 = arith.constant 0 : index
    %c0_2 = arith.constant 0 : index
    %2 = memref.load %arg5[%c0_1, %c0_2] : memref<1x1xi32, #tpu.memory_space<smem>>
    %3 = arith.sitofp %2 : i32 to f32
    %c0_i32 = arith.constant 0 : i32
    %4 = arith.cmpi eq, %arg0, %c0_i32 : i32
    %5 = arith.extui %4 : i1 to i32
    %c0_i32_3 = arith.constant 0 : i32
    %6 = arith.cmpi ne, %5, %c0_i32_3 : i32
    scf.if %6 {
      %c0_23 = arith.constant 0 : index
      %c0_24 = arith.constant 0 : index
      %66 = vector.load %arg2[%c0_23, %c0_24] : memref<128x128xi8, #tpu.memory_space<vmem>>, vector<128x128xi8>
      %67 = arith.sitofp %66 : vector<128x128xi8> to vector<128x128xf32>
      %c0_25 = arith.constant 0 : index
      %c0_26 = arith.constant 0 : index
      %68 = vector.load %arg7[%c0_25, %c0_26] : memref<1x128xi32, #tpu.memory_space<vmem>>, vector<1x128xi32>
      %69 = arith.sitofp %68 : vector<1x128xi32> to vector<1x128xf32>
      %70 = vector.broadcast %69 : vector<1x128xf32> to vector<128x128xf32>
      %71 = arith.subf %67, %70 : vector<128x128xf32>
      %c0_27 = arith.constant 0 : index
      %c0_28 = arith.constant 0 : index
      %72 = vector.load %arg6[%c0_27, %c0_28] : memref<1x128xf32, #tpu.memory_space<vmem>>, vector<1x128xf32>
      %73 = vector.broadcast %72 : vector<1x128xf32> to vector<128x128xf32>
      %74 = arith.mulf %71, %73 : vector<128x128xf32>
      %c0_29 = arith.constant 0 : index
      %c0_30 = arith.constant 0 : index
      %75 = vector.load %arg9[%c0_29, %c0_30] : memref<128x128xf32, #tpu.memory_space<vmem>>, vector<128x128xf32>
      tpu.vector_store %arg9[%c0_29, %c0_30], %74 {strides = array<i32>} : memref<128x128xf32, #tpu.memory_space<vmem>>, vector<128x128xf32>,
    } else {
    }
    %c0_4 = arith.constant 0 : index
    %c0_5 = arith.constant 0 : index
    %7 = vector.load %arg9[%c0_4, %c0_5] : memref<128x128xf32, #tpu.memory_space<vmem>>, vector<128x128xf32>
    %c0_6 = arith.constant 0 : index
    %c0_7 = arith.constant 0 : index
    %8 = vector.load %arg3[%c0_6, %c0_7] : memref<1x128xf32, #tpu.memory_space<vmem>>, vector<1x128xf32>
    %c0_8 = arith.constant 0 : index
    %c0_9 = arith.constant 0 : index
    %9 = vector.load %arg1[%c0_8, %c0_9] : memref<72x128xf32, #tpu.memory_space<vmem>>, vector<72x128xf32>
    %10 = vector.broadcast %1 : f32 to vector<72x128xf32>
    %11 = arith.mulf %9, %10 : vector<72x128xf32>
    %12 = math.roundeven %11 : vector<72x128xf32>
    %13 = vector.broadcast %3 : f32 to vector<72x128xf32>
    %14 = arith.addf %12, %13 : vector<72x128xf32>
    %cst_10 = arith.constant 0.000000e+00 : f32
    %cst_11 = arith.constant 2.550000e+02 : f32
    %15 = vector.broadcast %cst_10 : f32 to vector<72x128xf32>
    %16 = arith.maximumf %15, %14 : vector<72x128xf32>
    %17 = vector.broadcast %cst_11 : f32 to vector<72x128xf32>
    %18 = arith.minimumf %17, %16 : vector<72x128xf32>
    %19 = vector.broadcast %3 : f32 to vector<72x128xf32>
    %20 = arith.subf %18, %19 : vector<72x128xf32>
    %21 = vector.broadcast %0 : f32 to vector<72x128xf32>
    %22 = arith.mulf %20, %21 : vector<72x128xf32>
    %cst_12 = arith.constant dense<0.000000e+00> : vector<72x128xf32>
    %23 = tpu.matmul %22, %7, %cst_12 {dimension_numbers = #tpu.dot_dimension_numbers<[1], [0], [0], [1], [0, 0, 1, 1], [], []>} : vector<72x128xf32>, vector<128x128xf32>, vector<72x128xf32> -> vector<72x128xf32>
    %24 = vector.broadcast %8 : vector<1x128xf32> to vector<72x128xf32>
    %25 = arith.addf %23, %24 : vector<72x128xf32>
    %26 = vector.broadcast %1 : f32 to vector<72x128xf32>
    %27 = arith.mulf %25, %26 : vector<72x128xf32>
    %28 = math.roundeven %27 : vector<72x128xf32>
    %29 = vector.broadcast %3 : f32 to vector<72x128xf32>
    %30 = arith.addf %28, %29 : vector<72x128xf32>
    %cst_13 = arith.constant 0.000000e+00 : f32
    %cst_14 = arith.constant 2.550000e+02 : f32
    %31 = vector.broadcast %cst_13 : f32 to vector<72x128xf32>
    %32 = arith.maximumf %31, %30 : vector<72x128xf32>
    %33 = vector.broadcast %cst_14 : f32 to vector<72x128xf32>
    %34 = arith.minimumf %33, %32 : vector<72x128xf32>
    %35 = vector.broadcast %3 : f32 to vector<72x128xf32>
    %36 = arith.subf %34, %35 : vector<72x128xf32>
    %37 = vector.broadcast %0 : f32 to vector<72x128xf32>
    %38 = arith.mulf %36, %37 : vector<72x128xf32>
    %cst_15 = arith.constant dense<0.000000e+00> : vector<72x128xf32>
    %39 = tpu.matmul %38, %7, %cst_15 {dimension_numbers = #tpu.dot_dimension_numbers<[1], [0], [0], [1], [0, 0, 1, 1], [], []>} : vector<72x128xf32>, vector<128x128xf32>, vector<72x128xf32> -> vector<72x128xf32>
    %40 = vector.broadcast %8 : vector<1x128xf32> to vector<72x128xf32>
    %41 = arith.addf %39, %40 : vector<72x128xf32>
    %cst_16 = arith.constant 0.000000e+00 : f32
    %42 = vector.broadcast %cst_16 : f32 to vector<72x128xf32>
    %43 = arith.maximumf %41, %42 : vector<72x128xf32>
    %44 = vector.broadcast %1 : f32 to vector<72x128xf32>
    %45 = arith.mulf %43, %44 : vector<72x128xf32>
    %46 = math.roundeven %45 : vector<72x128xf32>
    %47 = vector.broadcast %3 : f32 to vector<72x128xf32>
    %48 = arith.addf %46, %47 : vector<72x128xf32>
    %cst_17 = arith.constant 0.000000e+00 : f32
    %cst_18 = arith.constant 2.550000e+02 : f32
    %49 = vector.broadcast %cst_17 : f32 to vector<72x128xf32>
    %50 = arith.maximumf %49, %48 : vector<72x128xf32>
    %51 = vector.broadcast %cst_18 : f32 to vector<72x128xf32>
    %52 = arith.minimumf %51, %50 : vector<72x128xf32>
    %53 = vector.broadcast %3 : f32 to vector<72x128xf32>
    %54 = arith.subf %52, %53 : vector<72x128xf32>
    %55 = vector.broadcast %0 : f32 to vector<72x128xf32>
    %56 = arith.mulf %54, %55 : vector<72x128xf32>
    %cst_19 = arith.constant dense<0.000000e+00> : vector<72x128xf32>
    %57 = tpu.matmul %56, %7, %cst_19 {dimension_numbers = #tpu.dot_dimension_numbers<[1], [0], [0], [1], [0, 0, 1, 1], [], []>} : vector<72x128xf32>, vector<128x128xf32>, vector<72x128xf32> -> vector<72x128xf32>
    %58 = vector.broadcast %8 : vector<1x128xf32> to vector<72x128xf32>
    %59 = arith.addf %57, %58 : vector<72x128xf32>
    %60 = arith.negf %59 : vector<72x128xf32>
    %61 = math.exp %60 : vector<72x128xf32>
    %cst_20 = arith.constant 1.000000e+00 : f32
    %62 = vector.broadcast %cst_20 : f32 to vector<72x128xf32>
    %63 = arith.addf %62, %61 : vector<72x128xf32>
    %64 = arith.divf %62, %63 : vector<72x128xf32>
    %c0_21 = arith.constant 0 : index
    %c0_22 = arith.constant 0 : index
    %65 = vector.load %arg8[%c0_21, %c0_22] : memref<72x128xf32, #tpu.memory_space<vmem>>, vector<72x128xf32>
    tpu.vector_store %arg8[%c0_21, %c0_22], %64 {strides = array<i32>} : memref<72x128xf32, #tpu.memory_space<vmem>>, vector<72x128xf32>,
    return
  }
  func.func @transform_0(%arg0: i32) -> (i32, i32) {
    %c0_i32 = arith.constant 0 : i32
    %c0_i32_0 = arith.constant 0 : i32
    return %arg0, %c0_i32 : i32, i32
  }
  func.func @transform_1(%arg0: i32) -> (i32, i32) {
    %c0_i32 = arith.constant 0 : i32
    %c0_i32_0 = arith.constant 0 : i32
    %c0_i32_1 = arith.constant 0 : i32
    return %c0_i32, %c0_i32_0 : i32, i32
  }
  func.func @transform_2(%arg0: i32) -> (i32, i32) {
    %c0_i32 = arith.constant 0 : i32
    %c0_i32_0 = arith.constant 0 : i32
    %c0_i32_1 = arith.constant 0 : i32
    return %c0_i32, %c0_i32_0 : i32, i32
  }
  func.func @transform_3(%arg0: i32) -> (i32, i32) {
    %c0_i32 = arith.constant 0 : i32
    %c0_i32_0 = arith.constant 0 : i32
    %c0_i32_1 = arith.constant 0 : i32
    return %c0_i32, %c0_i32_0 : i32, i32
  }
  func.func @transform_4(%arg0: i32) -> (i32, i32) {
    %c0_i32 = arith.constant 0 : i32
    %c0_i32_0 = arith.constant 0 : i32
    %c0_i32_1 = arith.constant 0 : i32
    return %c0_i32, %c0_i32_0 : i32, i32
  }
  func.func @transform_5(%arg0: i32) -> (i32, i32) {
    %c0_i32 = arith.constant 0 : i32
    %c0_i32_0 = arith.constant 0 : i32
    %c0_i32_1 = arith.constant 0 : i32
    return %c0_i32, %c0_i32_0 : i32, i32
  }
  func.func @transform_6(%arg0: i32) -> (i32, i32) {
    %c0_i32 = arith.constant 0 : i32
    %c0_i32_0 = arith.constant 0 : i32
    %c0_i32_1 = arith.constant 0 : i32
    return %c0_i32, %c0_i32_0 : i32, i32
  }
  func.func @transform_7(%arg0: i32) -> (i32, i32) {
    %c0_i32 = arith.constant 0 : i32
    %c0_i32_0 = arith.constant 0 : i32
    return %arg0, %c0_i32 : i32, i32
  }
}

module attributes {stable_mosaic.version = 11 : i64} {
  func.func @qlinear_mix_x3_kernel(%arg0: i32, %arg1: memref<72x128xf32, #tpu.memory_space<vmem>>, %arg2: memref<128x128xi8, #tpu.memory_space<vmem>>, %arg3: memref<1x128xf32, #tpu.memory_space<vmem>>, %arg4: memref<1x1xf32, #tpu.memory_space<smem>>, %arg5: memref<1x1xi32, #tpu.memory_space<smem>>, %arg6: memref<1x128xf32, #tpu.memory_space<vmem>>, %arg7: memref<1x128xi32, #tpu.memory_space<vmem>>, %arg8: memref<72x128xf32, #tpu.memory_space<vmem>>, %arg9: memref<128x128xf32, #tpu.memory_space<vmem>>) attributes {dimension_semantics = [#tpu.dimension_semantics<arbitrary>], iteration_bounds = array<i64: 1>, scalar_prefetch = 0 : i64, scratch_operands = 1 : i64, tpu.core_type = #tpu.core_type<tc>, window_params = [{transform_indices = @transform_0, window_bounds = array<i64: 72, 128>}, {pipeline_mode = #tpu.pipeline_mode<synchronous>, transform_indices = @transform_1, window_bounds = array<i64: 128, 128>}, {pipeline_mode = #tpu.pipeline_mode<synchronous>, transform_indices = @transform_2, window_bounds = array<i64: 1, 128>}, {transform_indices = @transform_3, window_bounds = array<i64: 1, 1>}, {transform_indices = @transform_4, window_bounds = array<i64: 1, 1>}, {pipeline_mode = #tpu.pipeline_mode<synchronous>, transform_indices = @transform_5, window_bounds = array<i64: 1, 128>}, {pipeline_mode = #tpu.pipeline_mode<synchronous>, transform_indices = @transform_6, window_bounds = array<i64: 1, 128>}, {transform_indices = @transform_7, window_bounds = array<i64: 72, 128>}]} {
    %c0 = arith.constant 0 : index
    %c0_0 = arith.constant 0 : index
    %0 = memref.load %arg4[%c0, %c0_0] : memref<1x1xf32, #tpu.memory_space<smem>>
    %cst = arith.constant 1.000000e+00 : f32
    %1 = arith.divf %cst, %0 : f32
    %c0_1 = arith.constant 0 : index
    %c0_2 = arith.constant 0 : index
    %2 = memref.load %arg5[%c0_1, %c0_2] : memref<1x1xi32, #tpu.memory_space<smem>>
    %3 = arith.sitofp %2 : i32 to f32
    %c0_i32 = arith.constant 0 : i32
    %4 = arith.cmpi eq, %arg0, %c0_i32 : i32
    %5 = arith.extui %4 : i1 to i32
    %c0_i32_3 = arith.constant 0 : i32
    %6 = arith.cmpi ne, %5, %c0_i32_3 : i32
    scf.if %6 {
      %c0_23 = arith.constant 0 : index
      %c0_24 = arith.constant 0 : index
      %66 = vector.load %arg2[%c0_23, %c0_24] : memref<128x128xi8, #tpu.memory_space<vmem>>, vector<128x128xi8>
      %67 = arith.sitofp %66 : vector<128x128xi8> to vector<128x128xf32>
      %c0_25 = arith.constant 0 : index
      %c0_26 = arith.constant 0 : index
      %68 = vector.load %arg7[%c0_25, %c0_26] : memref<1x128xi32, #tpu.memory_space<vmem>>, vector<1x128xi32>
      %69 = arith.sitofp %68 : vector<1x128xi32> to vector<1x128xf32>
      %70 = vector.broadcast %69 : vector<1x128xf32> to vector<128x128xf32>
      %71 = arith.subf %67, %70 : vector<128x128xf32>
      %c0_27 = arith.constant 0 : index
      %c0_28 = arith.constant 0 : index
      %72 = vector.load %arg6[%c0_27, %c0_28] : memref<1x128xf32, #tpu.memory_space<vmem>>, vector<1x128xf32>
      %73 = vector.broadcast %72 : vector<1x128xf32> to vector<128x128xf32>
      %74 = arith.mulf %71, %73 : vector<128x128xf32>
      %c0_29 = arith.constant 0 : index
      %c0_30 = arith.constant 0 : index
      %75 = vector.load %arg9[%c0_29, %c0_30] : memref<128x128xf32, #tpu.memory_space<vmem>>, vector<128x128xf32>
      tpu.vector_store %arg9[%c0_29, %c0_30], %74 {strides = array<i32>} : memref<128x128xf32, #tpu.memory_space<vmem>>, vector<128x128xf32>,
    } else {
    }
    %c0_4 = arith.constant 0 : index
    %c0_5 = arith.constant 0 : index
    %7 = vector.load %arg9[%c0_4, %c0_5] : memref<128x128xf32, #tpu.memory_space<vmem>>, vector<128x128xf32>
    %c0_6 = arith.constant 0 : index
    %c0_7 = arith.constant 0 : index
    %8 = vector.load %arg3[%c0_6, %c0_7] : memref<1x128xf32, #tpu.memory_space<vmem>>, vector<1x128xf32>
    %c0_8 = arith.constant 0 : index
    %c0_9 = arith.constant 0 : index
    %9 = vector.load %arg1[%c0_8, %c0_9] : memref<72x128xf32, #tpu.memory_space<vmem>>, vector<72x128xf32>
    %10 = vector.broadcast %1 : f32 to vector<72x128xf32>
    %11 = arith.mulf %9, %10 : vector<72x128xf32>
    %12 = math.roundeven %11 : vector<72x128xf32>
    %13 = vector.broadcast %3 : f32 to vector<72x128xf32>
    %14 = arith.addf %12, %13 : vector<72x128xf32>
    %cst_10 = arith.constant 0.000000e+00 : f32
    %cst_11 = arith.constant 2.550000e+02 : f32
    %15 = vector.broadcast %cst_10 : f32 to vector<72x128xf32>
    %16 = arith.maximumf %15, %14 : vector<72x128xf32>
    %17 = vector.broadcast %cst_11 : f32 to vector<72x128xf32>
    %18 = arith.minimumf %17, %16 : vector<72x128xf32>
    %19 = vector.broadcast %3 : f32 to vector<72x128xf32>
    %20 = arith.subf %18, %19 : vector<72x128xf32>
    %21 = vector.broadcast %0 : f32 to vector<72x128xf32>
    %22 = arith.mulf %20, %21 : vector<72x128xf32>
    %cst_12 = arith.constant dense<0.000000e+00> : vector<72x128xf32>
    %23 = tpu.matmul %22, %7, %cst_12 {dimension_numbers = #tpu.dot_dimension_numbers<[1], [0], [0], [1], [0, 0, 1, 1], [], []>} : vector<72x128xf32>, vector<128x128xf32>, vector<72x128xf32> -> vector<72x128xf32>
    %24 = vector.broadcast %8 : vector<1x128xf32> to vector<72x128xf32>
    %25 = arith.addf %23, %24 : vector<72x128xf32>
    %26 = vector.broadcast %1 : f32 to vector<72x128xf32>
    %27 = arith.mulf %25, %26 : vector<72x128xf32>
    %28 = math.roundeven %27 : vector<72x128xf32>
    %29 = vector.broadcast %3 : f32 to vector<72x128xf32>
    %30 = arith.addf %28, %29 : vector<72x128xf32>
    %cst_13 = arith.constant 0.000000e+00 : f32
    %cst_14 = arith.constant 2.550000e+02 : f32
    %31 = vector.broadcast %cst_13 : f32 to vector<72x128xf32>
    %32 = arith.maximumf %31, %30 : vector<72x128xf32>
    %33 = vector.broadcast %cst_14 : f32 to vector<72x128xf32>
    %34 = arith.minimumf %33, %32 : vector<72x128xf32>
    %35 = vector.broadcast %3 : f32 to vector<72x128xf32>
    %36 = arith.subf %34, %35 : vector<72x128xf32>
    %37 = vector.broadcast %0 : f32 to vector<72x128xf32>
    %38 = arith.mulf %36, %37 : vector<72x128xf32>
    %cst_15 = arith.constant dense<0.000000e+00> : vector<72x128xf32>
    %39 = tpu.matmul %38, %7, %cst_15 {dimension_numbers = #tpu.dot_dimension_numbers<[1], [0], [0], [1], [0, 0, 1, 1], [], []>} : vector<72x128xf32>, vector<128x128xf32>, vector<72x128xf32> -> vector<72x128xf32>
    %40 = vector.broadcast %8 : vector<1x128xf32> to vector<72x128xf32>
    %41 = arith.addf %39, %40 : vector<72x128xf32>
    %cst_16 = arith.constant 0.000000e+00 : f32
    %42 = vector.broadcast %cst_16 : f32 to vector<72x128xf32>
    %43 = arith.maximumf %41, %42 : vector<72x128xf32>
    %44 = vector.broadcast %1 : f32 to vector<72x128xf32>
    %45 = arith.mulf %43, %44 : vector<72x128xf32>
    %46 = math.roundeven %45 : vector<72x128xf32>
    %47 = vector.broadcast %3 : f32 to vector<72x128xf32>
    %48 = arith.addf %46, %47 : vector<72x128xf32>
    %cst_17 = arith.constant 0.000000e+00 : f32
    %cst_18 = arith.constant 2.550000e+02 : f32
    %49 = vector.broadcast %cst_17 : f32 to vector<72x128xf32>
    %50 = arith.maximumf %49, %48 : vector<72x128xf32>
    %51 = vector.broadcast %cst_18 : f32 to vector<72x128xf32>
    %52 = arith.minimumf %51, %50 : vector<72x128xf32>
    %53 = vector.broadcast %3 : f32 to vector<72x128xf32>
    %54 = arith.subf %52, %53 : vector<72x128xf32>
    %55 = vector.broadcast %0 : f32 to vector<72x128xf32>
    %56 = arith.mulf %54, %55 : vector<72x128xf32>
    %cst_19 = arith.constant dense<0.000000e+00> : vector<72x128xf32>
    %57 = tpu.matmul %56, %7, %cst_19 {dimension_numbers = #tpu.dot_dimension_numbers<[1], [0], [0], [1], [0, 0, 1, 1], [], []>} : vector<72x128xf32>, vector<128x128xf32>, vector<72x128xf32> -> vector<72x128xf32>
    %58 = vector.broadcast %8 : vector<1x128xf32> to vector<72x128xf32>
    %59 = arith.addf %57, %58 : vector<72x128xf32>
    %60 = arith.negf %59 : vector<72x128xf32>
    %61 = math.exp %60 : vector<72x128xf32>
    %cst_20 = arith.constant 1.000000e+00 : f32
    %62 = vector.broadcast %cst_20 : f32 to vector<72x128xf32>
    %63 = arith.addf %62, %61 : vector<72x128xf32>
    %64 = arith.divf %62, %63 : vector<72x128xf32>
    %c0_21 = arith.constant 0 : index
    %c0_22 = arith.constant 0 : index
    %65 = vector.load %arg8[%c0_21, %c0_22] : memref<72x128xf32, #tpu.memory_space<vmem>>, vector<72x128xf32>
    tpu.vector_store %arg8[%c0_21, %c0_22], %64 {strides = array<i32>} : memref<72x128xf32, #tpu.memory_space<vmem>>, vector<72x128xf32>,
    return
  }
  func.func @transform_0(%arg0: i32) -> (i32, i32) {
    %c0_i32 = arith.constant 0 : i32
    %c0_i32_0 = arith.constant 0 : i32
    return %arg0, %c0_i32 : i32, i32
  }
  func.func @transform_1(%arg0: i32) -> (i32, i32) {
    %c0_i32 = arith.constant 0 : i32
    %c0_i32_0 = arith.constant 0 : i32
    %c0_i32_1 = arith.constant 0 : i32
    return %c0_i32, %c0_i32_0 : i32, i32
  }
  func.func @transform_2(%arg0: i32) -> (i32, i32) {
    %c0_i32 = arith.constant 0 : i32
    %c0_i32_0 = arith.constant 0 : i32
    %c0_i32_1 = arith.constant 0 : i32
    return %c0_i32, %c0_i32_0 : i32, i32
  }
  func.func @transform_3(%arg0: i32) -> (i32, i32) {
    %c0_i32 = arith.constant 0 : i32
    %c0_i32_0 = arith.constant 0 : i32
    %c0_i32_1 = arith.constant 0 : i32
    return %c0_i32, %c0_i32_0 : i32, i32
  }
  func.func @transform_4(%arg0: i32) -> (i32, i32) {
    %c0_i32 = arith.constant 0 : i32
    %c0_i32_0 = arith.constant 0 : i32
    %c0_i32_1 = arith.constant 0 : i32
    return %c0_i32, %c0_i32_0 : i32, i32
  }
  func.func @transform_5(%arg0: i32) -> (i32, i32) {
    %c0_i32 = arith.constant 0 : i32
    %c0_i32_0 = arith.constant 0 : i32
    %c0_i32_1 = arith.constant 0 : i32
    return %c0_i32, %c0_i32_0 : i32, i32
  }
  func.func @transform_6(%arg0: i32) -> (i32, i32) {
    %c0_i32 = arith.constant 0 : i32
    %c0_i32_0 = arith.constant 0 : i32
    %c0_i32_1 = arith.constant 0 : i32
    return %c0_i32, %c0_i32_0 : i32, i32
  }
  func.func @transform_7(%arg0: i32) -> (i32, i32) {
    %c0_i32 = arith.constant 0 : i32
    %c0_i32_0 = arith.constant 0 : i32
    return %arg0, %c0_i32 : i32, i32
  }
}

</mosaic_0001>

<bundles_post_ra>
// kernel: tpu_custom_call.1
= control target key start
LH: loop header
LB: loop body
LE: loop exit
PB: predicated region body
PF: predicated region fallthrough
CT: control target
= control target key end

     0   :  { %14 = vsyncpa [#allocation6], 0  ;;  %s1874_s0 = inlined_call_operand.hbm [shape: f32[72,128], index: 0, kind: input, shape index: {}]   ;;  %s1875_s1 = inlined_call_operand.hbm [shape: s8[128,128], index: 1, kind: input, shape index: {}]   ;;  %s1876_s2 = inlined_call_operand.hbm [shape: f32[1,128], index: 2, kind: input, shape index: {}]   ;;  %s1877_s3 = inlined_call_operand.<no memory space> [shape: f32[1,1], index: 3, kind: input, shape index: {}]   ;;  %s1878_s4 = inlined_call_operand.<no memory space> [shape: s32[1,1], index: 4, kind: input, shape index: {}]   ;;  %s1879_s5 = inlined_call_operand.hbm [shape: f32[1,128], index: 5, kind: input, shape index: {}]   ;;  %s1880_s6 = inlined_call_operand.hbm [shape: s32[1,128], index: 6, kind: input, shape index: {}]   ;;  %s1881_s7 = inlined_call_operand.hbm [shape: f32[72,128], index: 7, kind: output, shape index: {}]  }
   0x1   :  { %15 = vsyncpa [#allocation9], 0 }
   0x2   :  { %16 = vsyncpa [#allocation12], 0 }
   0x3   :  { %17 = vsyncpa [#allocation7], 0  ;;  %s1414_s24 = smov [#allocation8]   ;;  %s1415_s26 = smov [#allocation11]  }
   0x4   :  { %s35_s25 = sshll.u32 %s1414_s24, 4  ;;  %s62_s27 = sshll.u32 %s1415_s26, 4  ;;  %s36_s25 = int_to_ptr.vmem [resolvable:$true] %s35_s25  ;;  %s1465_s27 = int_to_ptr.vmem [resolvable:$true] %s62_s27 }
   0x5   :  { %s1274_s30 = scalar_lea.hbm %s1875_s1, 512 }
   0x6   :  { %p1275_p0 = scmp.ne.s32.totalorder %s1875_s1, %s1274_s30  ;;  %p1278_p1 = scmp.lt.u32.totalorder %s1274_s30, %s1875_s1 }
   0x8   :  { %p1280_p2 = pnand %p1278_p1, %p1275_p0 }
   0xa   :  { %1283 = shalt.err (!%p1280_p2)
}
   0xb   :  { %s1284_s12 = scalar_lea.vmem %s36_s25, 512  ;;  %p1289_p4 = scmp.lt.s32.totalorder %s36_s25, %s36_s25 }
   0xc   :  { %p1285_p3 = scmp.ne.s32.totalorder %s36_s25, %s1284_s12  ;;  %p1290_p5 = scmp.lt.s32.totalorder %s1284_s12, %s1284_s12 }
   0xe   :  { %p1291_p6 = por %p1290_p5, %p1289_p4 }
  0x10   :  { %p1292_p7 = pnand %p1291_p6, %p1285_p3 }
  0x12   :  { %1295 = shalt.err (!%p1292_p7)
}
  0x13   :  { %s1416_s13 = smov 128   ;;  %s1417_s14 = smov 8  }
  0x14   :  { %41 = dma.hbm_to_vmem [thread:$0]  %s1875_s1, 512, %s36_s25, [#allocation9], %s1416_s13, %s1416_s13, %s1417_s14  }
  0x15   :  { %s1296_s19 = scalar_lea.hbm %s1879_s5, 16 }
  0x16   :  { %p1297_p8 = scmp.ne.s32.totalorder %s1879_s5, %s1296_s19  ;;  %p1300_p9 = scmp.lt.u32.totalorder %s1296_s19, %s1879_s5 }
  0x18   :  { %p1302_p10 = pnand %p1300_p9, %p1297_p8 }
  0x1a   :  { %1305 = shalt.err (!%p1302_p10)
}
  0x1b   :  { %s1306_s24 = scalar_lea.vmem %s1465_s27, 16  ;;  %s1310_s1 = scalar_lea.vmem %s1465_s27, 32 }
  0x1c   :  { %p1307_p11 = scmp.ne.s32.totalorder %s1465_s27, %s1306_s24  ;;  %p1311_p12 = scmp.lt.s32.totalorder %s1465_s27, %s1465_s27 }
  0x1d   :  { %p1312_p13 = scmp.lt.s32.totalorder %s1310_s1, %s1306_s24 }
  0x1f   :  { %p1313_p0 = por %p1312_p13, %p1311_p12 }
  0x21   :  { %p1314_p1 = pnand %p1313_p0, %p1307_p11 }
  0x23   :  { %1317 = shalt.err (!%p1314_p1)
}
  0x24   :  { %65 = dma.hbm_to_vmem [thread:$0]  %s1879_s5, 16, %s1465_s27, [#allocation12]  }
  0x25   :  { %s1418_s28 = smov [#allocation5]   ;;  %s1419_s30 = smov [#allocation10]  }
  0x26   :  { %s23_s29 = sshll.u32 %s1418_s28, 4  ;;  %s48_s8 = sshll.u32 %s1419_s30, 4  ;;  %s24_s29 = int_to_ptr.vmem [resolvable:$true] %s23_s29  ;;  %s49_s8 = int_to_ptr.vmem [resolvable:$true] %s48_s8 }
  0x27   :  { %s1318_s11 = scalar_lea.hbm %s1874_s0, 1152 }
  0x28   :  { %p1319_p2 = scmp.ne.s32.totalorder %s1874_s0, %s1318_s11  ;;  %p1322_p3 = scmp.lt.u32.totalorder %s1318_s11, %s1874_s0 }
  0x2a   :  { %p1324_p4 = pnand %p1322_p3, %p1319_p2 }
  0x2c   :  { %1327 = shalt.err (!%p1324_p4)
}
  0x2d   :  { %s1328_s5 = scalar_lea.vmem %s24_s29, 1152  ;;  %p1333_p6 = scmp.lt.s32.totalorder %s24_s29, %s24_s29 }
  0x2e   :  { %p1329_p5 = scmp.ne.s32.totalorder %s24_s29, %s1328_s5  ;;  %p1334_p7 = scmp.lt.s32.totalorder %s1328_s5, %s1328_s5 }
  0x30   :  { %p1335_p8 = por %p1334_p7, %p1333_p6 }
  0x32   :  { %p1336_p9 = pnand %p1335_p8, %p1329_p5 }
  0x34   :  { %1339 = shalt.err (!%p1336_p9)
}
  0x35   :  { %29 = dma.hbm_to_vmem [thread:$0]  %s1874_s0, 1152, %s24_s29, [#allocation6], %s1416_s13, %s1416_s13, %s1417_s14  }
  0x36   :  { %s1340_s21 = scalar_lea.hbm %s1876_s2, 16 }
  0x37   :  { %p1341_p10 = scmp.ne.s32.totalorder %s1876_s2, %s1340_s21  ;;  %p1344_p11 = scmp.lt.u32.totalorder %s1340_s21, %s1876_s2 }
  0x39   :  { %p1346_p12 = pnand %p1344_p11, %p1341_p10 }
  0x3b   :  { %1349 = shalt.err (!%p1346_p12)
}
  0x3c   :  { %s1350_s25 = scalar_lea.vmem %s49_s8, 16  ;;  %s1354_s26 = scalar_lea.vmem %s49_s8, 32 }
  0x3d   :  { %p1351_p13 = scmp.ne.s32.totalorder %s49_s8, %s1350_s25  ;;  %p1355_p0 = scmp.lt.s32.totalorder %s49_s8, %s49_s8 }
  0x3e   :  { %p1356_p1 = scmp.lt.s32.totalorder %s1354_s26, %s1350_s25 }
  0x40   :  { %p1357_p2 = por %p1356_p1, %p1355_p0 }
  0x42   :  { %p1358_p3 = pnand %p1357_p2, %p1351_p13 }
  0x44   :  { %1361 = shalt.err (!%p1358_p3)
}
  0x45   :  { %51 = dma.hbm_to_vmem [thread:$0]  %s1876_s2, 16, %s49_s8, [#allocation9]  }
  0x46   :  { %s1420_s29 = smov [#allocation13]   ;;  %s1362_s11 = scalar_lea.hbm %s1880_s6, 16 }
  0x47   :  { %s72_s30 = sshll.u32 %s1420_s29, 4  ;;  %p1363_p4 = scmp.ne.s32.totalorder %s1880_s6, %s1362_s11  ;;  %s73_s30 = int_to_ptr.vmem [resolvable:$true] %s72_s30 }
  0x48   :  { %p1366_p5 = scmp.lt.u32.totalorder %s1362_s11, %s1880_s6 }
  0x4a   :  { %p1368_p6 = pnand %p1366_p5, %p1363_p4 }
  0x4c   :  { %1371 = shalt.err (!%p1368_p6)
}
  0x4d   :  { %s1372_s5 = scalar_lea.vmem %s73_s30, 16  ;;  %s1376_s2 = scalar_lea.vmem %s73_s30, 32 }
  0x4e   :  { %p1373_p7 = scmp.ne.s32.totalorder %s73_s30, %s1372_s5  ;;  %p1377_p8 = scmp.lt.s32.totalorder %s73_s30, %s73_s30 }
  0x4f   :  { %p1378_p9 = scmp.lt.s32.totalorder %s1376_s2, %s1372_s5 }
  0x51   :  { %p1379_p10 = por %p1378_p9, %p1377_p8 }
  0x53   :  { %p1380_p11 = pnand %p1379_p10, %p1373_p7 }
  0x55   :  { %1383 = shalt.err (!%p1380_p11)
}
  0x56   :  { %75 = dma.hbm_to_vmem [thread:$0]  %s1880_s6, 16, %s73_s30, [#allocation12]  }
  0x57   :  { %1406 = dma.done.wait [#allocation6], 1152  }
  0x58   :  { %1407 = vsyncadd [#allocation6], 4294966144 }
  0x59   :  { %1408 = dma.done.wait [#allocation9], 528  }
  0x5a   :  { %1409 = vsyncadd [#allocation9], 4294966768  ;;  %v1542_v0 = vstv %s1877_s3 }
  0x5b   :  { %1410 = dma.done.wait [#allocation12], 32  }
  0x5c   :  { %1411 = vsyncadd [#allocation12], 4294967264  ;;  %v140_v1 = vlaneseq  ;;  %1236 = vrcp.f32 %v1542_v0  ;;  %v1421_v2 = vmov 0.0|0.0   ;;  %vm1422_vm0 = vmmov 0   ;;  %v101_v6 = vld [vmem:[#allocation8] sm:$0xff]  ;;  %v102_v12 = vld [vmem:[#allocation8 + $0x8] sm:$0xff]  ;;  %s96_s20 = scvt.s32.f32 %s1878_s4 }
  0x5d   :  { %1108 = vmatprep.subr.bf16.mxu0 %v1421_v2  ;;  %1132 = vmatprep.subr.bf16.mxu1 %v1421_v2  ;;  %v1423_v4 = vmov 0.0   ;;  %v137_v7 = vld [vmem:[#allocation13] sm:$0x1]  ;;  %v105_v8 = vunpack.c.0.s8 %v101_v6  ;;  %v106_v9 = vunpack.c.1.s8 %v101_v6  ;;  %v107_v11 = vunpack.c.2.s8 %v101_v6  ;;  %v1553_v22 = vld [vmem:[#allocation11] ss:$0 sm:$0xff]  ;;  %v103_v35 = vld [vmem:[#allocation8 + $0x10] sm:$0xff] }
  0x5e   :  { %v141_v3 = vshrl.u32 %v140_v1, 7  ;;  %963 = vmatprep.mubr.msk.f32.mxu0 %vm1422_vm0, %v1423_v4  ;;  %1022 = vmatprep.mubr.msk.f32.mxu1 %vm1422_vm0, %v1423_v4  ;;  %v138_v10 = vcvt.s32.f32 %v137_v7  ;;  %v108_v13 = vunpack.c.3.s8 %v101_v6  ;;  %v109_v14 = vunpack.c.0.s8 %v102_v12  ;;  %v104_v52 = vld [vmem:[#allocation8 + $0x18] sm:$0xff]  ;;  %s1424_s4 = smov [#allocation14]  }
  0x5f   :  { %v110_v15 = vunpack.c.1.s8 %v102_v12  ;;  %v111_v16 = vunpack.c.2.s8 %v102_v12  ;;  %v121_v17 = vcvt.s32.f32 %v105_v8  ;;  %v122_v18 = vcvt.s32.f32 %v106_v9  ;;  %s831_s22 = sshll.u32 %s1424_s4, 4  ;;  %s832_s22 = int_to_ptr.vmem [resolvable:$true] %s831_s22 }
  0x60   :  { %v142_v5 = vsub.s32 0, %v141_v3  ;;  %v123_v20 = vcvt.s32.f32 %v107_v11  ;;  %v124_v23 = vcvt.s32.f32 %v108_v13  ;;  %v125_v24 = vcvt.s32.f32 %v109_v14  ;;  %s1384_s23 = scalar_lea.vmem %s832_s22, 1152  ;;  %p1389_p13 = scmp.lt.s32.totalorder %s832_s22, %s832_s22 }
  0x61   :  { %v126_v25 = vcvt.s32.f32 %v110_v15  ;;  %v112_v26 = vunpack.c.3.s8 %v102_v12  ;;  %v127_v30 = vcvt.s32.f32 %v111_v16  ;;  %v113_v43 = vunpack.c.0.s8 %v103_v35  ;;  %p1385_p12 = scmp.ne.s32.totalorder %s832_s22, %s1384_s23  ;;  %p1390_p0 = scmp.lt.s32.totalorder %s1384_s23, %s1384_s23 }
  0x62   :  { %v1551_v19 = vrot.slane %v138_v10, %v142_v5  ;;  %v114_v44 = vunpack.c.1.s8 %v103_v35  ;;  %v115_v47 = vunpack.c.2.s8 %v103_v35  ;;  %v116_v51 = vunpack.c.3.s8 %v103_v35  ;;  %v221_v35 = vld [vmem:[#allocation5 + $0x20] sm:$0xff] }
  0x63   :  { %v128_v34 = vcvt.s32.f32 %v112_v26  ;;  %v129_v49 = vcvt.s32.f32 %v113_v43  ;;  %v117_v56 = vunpack.c.0.s8 %v104_v52  ;;  %v118_v57 = vunpack.c.1.s8 %v104_v52  ;;  %p1391_p1 = por %p1390_p0, %p1389_p13 }
  0x64   :  { %v145_v27 = vsub.f32 %v121_v17, %v1551_v19  ;;  %v146_v28 = vsub.f32 %v122_v18, %v1551_v19  ;;  %v147_v29 = vsub.f32 %v123_v20, %v1551_v19  ;;  %v148_v31 = vsub.f32 %v124_v23, %v1551_v19 }
  0x65   :  { %v149_v32 = vsub.f32 %v125_v24, %v1551_v19  ;;  %v150_v33 = vsub.f32 %v126_v25, %v1551_v19  ;;  %v151_v40 = vsub.f32 %v127_v30, %v1551_v19  ;;  %v152_v42 = vsub.f32 %v128_v34, %v1551_v19  ;;  %p1392_p2 = pnand %p1391_p1, %p1385_p12 }
  0x66   :  { %v1237_v21 = vpop.eup %1236  ;;  %v168_v36 = vmul.f32 %v1553_v22, %v145_v27  ;;  %v169_v37 = vmul.f32 %v1553_v22, %v146_v28  ;;  %v170_v38 = vmul.f32 %v1553_v22, %v147_v29  ;;  %v171_v39 = vmul.f32 %v1553_v22, %v148_v31  ;;  %v218_v27 = vld [vmem:[#allocation5 + $0x8] sm:$0xff]  ;;  %v219_v28 = vld [vmem:[#allocation5 + $0x10] sm:$0xff]  ;;  %v220_v29 = vld [vmem:[#allocation5 + $0x18] sm:$0xff] }
  0x67   :  { %1196 = vpush %v1237_v21  ;;  %v172_v45 = vmul.f32 %v1553_v22, %v149_v32  ;;  %v173_v46 = vmul.f32 %v1553_v22, %v150_v33  ;;  %v130_v50 = vcvt.s32.f32 %v114_v44  ;;  %v174_v53 = vmul.f32 %v1553_v22, %v151_v40 }
  0x68   :  { %v1566_v41 = vpack.c.bf16 %v169_v37, %v168_v36  ;;  %v1572_v48 = vpack.c.bf16 %v171_v39, %v170_v38  ;;  %v175_v54 = vmul.f32 %v1553_v22, %v152_v42  ;;  %v131_v55 = vcvt.s32.f32 %v115_v47 }
  0x69   :  { %v1580_v58 = vpack.c.bf16 %v173_v46, %v172_v45  ;;  %v153_v59 = vsub.f32 %v129_v49, %v1551_v19  ;;  %v154_v60 = vsub.f32 %v130_v50, %v1551_v19  ;;  %v132_v61 = vcvt.s32.f32 %v116_v51  ;;  %v222_v46 = vld [vmem:[#allocation5 + $0x28] sm:$0xff] }
  0x6a   :  { %1110 = vmatpush3.bf16.msra.mxu0 %v1566_v41  ;;  %1134 = vmatpush3.bf16.msra.mxu1 %v1566_v41  ;;  %v1586_v62 = vpack.c.bf16 %v175_v54, %v174_v53  ;;  %v155_v63 = vsub.f32 %v131_v55, %v1551_v19  ;;  %v133_v1 = vcvt.s32.f32 %v117_v56  ;;  %v134_v3 = vcvt.s32.f32 %v118_v57  ;;  %v223_v56 = vld [vmem:[#allocation5 + $0x30] sm:$0xff] }
  0x6b   :  { %1111 = vmatprep.subr.bf16.mxu0 %v1421_v2  ;;  %1135 = vmatprep.subr.bf16.mxu1 %v1421_v2  ;;  %v119_v5 = vunpack.c.2.s8 %v104_v52  ;;  %v176_v6 = vmul.f32 %v1553_v22, %v153_v59  ;;  %v177_v7 = vmul.f32 %v1553_v22, %v154_v60  ;;  %v156_v8 = vsub.f32 %v132_v61, %v1551_v19 }
  0x6c   :  { %v120_v9 = vunpack.c.3.s8 %v104_v52  ;;  %v178_v10 = vmul.f32 %v1553_v22, %v155_v63  ;;  %v157_v11 = vsub.f32 %v133_v1, %v1551_v19  ;;  %v158_v15 = vsub.f32 %v134_v3, %v1551_v19 }
  0x6d   :  { %v135_v12 = vcvt.s32.f32 %v119_v5  ;;  %v1600_v13 = vpack.c.bf16 %v177_v7, %v176_v6  ;;  %v179_v14 = vmul.f32 %v1553_v22, %v156_v8  ;;  %v1644_v36 = vstv %s96_s20  ;;  %v224_v6 = vld [vmem:[#allocation5 + $0x38] sm:$0xff] }
  0x6e   :  { %1113 = vmatpush3.bf16.msra.mxu0 %v1572_v48  ;;  %1137 = vmatpush3.bf16.msra.mxu1 %v1572_v48  ;;  %v136_v16 = vcvt.s32.f32 %v120_v9  ;;  %v180_v20 = vmul.f32 %v1553_v22, %v157_v11  ;;  %v181_v21 = vmul.f32 %v1553_v22, %v158_v15  ;;  %v225_v15 = vld [vmem:[#allocation5 + $0x40] sm:$0xff] }
  0x6f   :  { %1114 = vmatprep.subr.bf16.mxu0 %v1421_v2  ;;  %1138 = vmatprep.subr.bf16.mxu1 %v1421_v2  ;;  %v159_v17 = vsub.f32 %v135_v12, %v1551_v19  ;;  %v1609_v18 = vpack.c.bf16 %v179_v14, %v178_v10 }
  0x70   :  { %v160_v23 = vsub.f32 %v136_v16, %v1551_v19  ;;  %v1618_v24 = vpack.c.bf16 %v181_v21, %v180_v20 }
  0x71   :  { %v182_v25 = vmul.f32 %v1553_v22, %v159_v17 }
  0x72   :  { %1116 = vmatpush3.bf16.msra.mxu0 %v1580_v58  ;;  %1140 = vmatpush3.bf16.msra.mxu1 %v1580_v58  ;;  %v183_v26 = vmul.f32 %v1553_v22, %v160_v23  ;;  %v217_v22 = vld [vmem:[#allocation5] sm:$0xff] }
  0x73   :  { %1117 = vmatprep.subr.bf16.mxu0 %v1421_v2  ;;  %1141 = vmatprep.subr.bf16.mxu1 %v1421_v2 }
  0x74   :  { %v1626_v19 = vpack.c.bf16 %v183_v26, %v182_v25 }
  0x76   :  { %1119 = vmatpush3.bf16.msra.mxu0 %v1586_v62  ;;  %1143 = vmatpush3.bf16.msra.mxu1 %v1586_v62 }
  0x77   :  { %1120 = vmatprep.subr.bf16.mxu0 %v1421_v2  ;;  %1144 = vmatprep.subr.bf16.mxu1 %v1421_v2 }
  0x7a   :  { %1122 = vmatpush3.bf16.msra.mxu0 %v1600_v13  ;;  %1146 = vmatpush3.bf16.msra.mxu1 %v1600_v13 }
  0x7b   :  { %1123 = vmatprep.subr.bf16.mxu0 %v1421_v2  ;;  %1147 = vmatprep.subr.bf16.mxu1 %v1421_v2 }
  0x7e   :  { %1125 = vmatpush3.bf16.msra.mxu0 %v1609_v18  ;;  %1149 = vmatpush3.bf16.msra.mxu1 %v1609_v18 }
  0x7f   :  { %1126 = vmatprep.subr.bf16.mxu0 %v1421_v2  ;;  %1150 = vmatprep.subr.bf16.mxu1 %v1421_v2 }
  0x82   :  { %1128 = vmatpush3.bf16.msra.mxu0 %v1618_v24  ;;  %1152 = vmatpush3.bf16.msra.mxu1 %v1618_v24 }
  0x83   :  { %1129 = vmatprep.subr.bf16.mxu0 %v1421_v2  ;;  %1153 = vmatprep.subr.bf16.mxu1 %v1421_v2 }
  0x86   :  { %1131 = vmatpush3.bf16.msra.mxu0 %v1626_v19  ;;  %1155 = vmatpush3.bf16.msra.mxu1 %v1626_v19 }
  0x87   :  { %1156 = vmatprep.subr.bf16.mxu0 %v1421_v2  ;;  %1180 = vmatprep.subr.bf16.mxu1 %v1421_v2 }
  0x98   :  { %s1197_s21 = spop %1196 }
  0x99   :  { %v1638_v30 = vstv %s1197_s21 }
  0x9a   :  { %v227_v31 = vmul.f32 %v1638_v30, %v217_v22  ;;  %v228_v32 = vmul.f32 %v1638_v30, %v218_v27  ;;  %v229_v33 = vmul.f32 %v1638_v30, %v219_v28  ;;  %v230_v34 = vmul.f32 %v1638_v30, %v220_v29 }
  0x9b   :  { %v231_v40 = vmul.f32 %v1638_v30, %v221_v35  ;;  %v232_v51 = vmul.f32 %v1638_v30, %v222_v46  ;;  %v233_v61 = vmul.f32 %v1638_v30, %v223_v56  ;;  %v234_v9 = vmul.f32 %v1638_v30, %v224_v6 }
  0x9c   :  { %v1198_v37 = vround.rtne.f32 %v227_v31  ;;  %v1199_v38 = vround.rtne.f32 %v228_v32  ;;  %v1200_v39 = vround.rtne.f32 %v229_v33  ;;  %v1201_v45 = vround.rtne.f32 %v230_v34 }
  0x9d   :  { %v1202_v50 = vround.rtne.f32 %v231_v40  ;;  %v1203_v60 = vround.rtne.f32 %v232_v51  ;;  %v1204_v8 = vround.rtne.f32 %v233_v61  ;;  %v1205_v20 = vround.rtne.f32 %v234_v9  ;;  %v1711_v51 = vld [vmem:[#allocation10] ss:$0 sm:$0xff] }
  0x9e   :  { %v246_v42 = vadd.f32 %v1198_v37, %v1644_v36  ;;  %v247_v43 = vadd.f32 %v1199_v38, %v1644_v36  ;;  %v248_v44 = vadd.f32 %v1200_v39, %v1644_v36  ;;  %v249_v55 = vadd.f32 %v1201_v45, %v1644_v36 }
  0x9f   :  { %v250_v59 = vadd.f32 %v1202_v50, %v1644_v36  ;;  %v251_v7 = vadd.f32 %v1203_v60, %v1644_v36  ;;  %v252_v17 = vadd.f32 %v1204_v8, %v1644_v36  ;;  %v235_v26 = vmul.f32 %v1638_v30, %v225_v15 }
  0xa0   :  { %v255_v47 = vmax.f32 %v246_v42, 0.0  ;;  %v256_v49 = vmax.f32 %v247_v43, 0.0  ;;  %v257_v54 = vmax.f32 %v248_v44, 0.0  ;;  %v258_v5 = vmax.f32 %v249_v55, 0.0 }
  0xa1   :  { %v259_v14 = vmax.f32 %v250_v59, 0.0  ;;  %v260_v16 = vmax.f32 %v251_v7, 0.0  ;;  %v261_v22 = vmax.f32 %v252_v17, 0.0  ;;  %v253_v27 = vadd.f32 %v1205_v20, %v1644_v36 }
  0xa2   :  { %v264_v52 = vmin.f32 %v255_v47, 255.0  ;;  %v265_v53 = vmin.f32 %v256_v49, 255.0  ;;  %v266_v3 = vmin.f32 %v257_v54, 255.0  ;;  %v267_v12 = vmin.f32 %v258_v5, 255.0 }
  0xa3   :  { %v268_v25 = vmin.f32 %v259_v14, 255.0  ;;  %v269_v31 = vmin.f32 %v260_v16, 255.0  ;;  %v1206_v32 = vround.rtne.f32 %v235_v26  ;;  %v262_v33 = vmax.f32 %v253_v27, 0.0 }
  0xa4   :  { %v273_v57 = vsub.f32 %v264_v52, %v1644_v36  ;;  %v274_v1 = vsub.f32 %v265_v53, %v1644_v36  ;;  %v275_v11 = vsub.f32 %v266_v3, %v1644_v36  ;;  %v276_v23 = vsub.f32 %v267_v12, %v1644_v36 }
  0xa5   :  { %v277_v29 = vsub.f32 %v268_v25, %v1644_v36  ;;  %v278_v35 = vsub.f32 %v269_v31, %v1644_v36  ;;  %v270_v37 = vmin.f32 %v261_v22, 255.0  ;;  %v254_v38 = vadd.f32 %v1206_v32, %v1644_v36 }
  0xa6   :  { %v283_v63 = vmul.f32 %v273_v57, %v1542_v0  ;;  %v284_v10 = vmul.f32 %v274_v1, %v1542_v0  ;;  %v285_v21 = vmul.f32 %v275_v11, %v1542_v0  ;;  %v286_v28 = vmul.f32 %v276_v23, %v1542_v0 }
  0xa7   :  { %v287_v34 = vmul.f32 %v277_v29, %v1542_v0  ;;  %v288_v39 = vmul.f32 %v278_v35, %v1542_v0  ;;  %v279_v40 = vsub.f32 %v270_v37, %v1644_v36  ;;  %v271_v42 = vmin.f32 %v262_v33, 255.0 }
  0xa8   :  { %964 = vmatmul.mubr.f32.vlgmr.msra.gmra.mrb[0].mxu0 %v283_v63  ;;  %v263_v43 = vmax.f32 %v254_v38, 0.0 }
  0xa9   :  { %966 = vmatprep.mubr.msk.f32.mxu0 %vm1422_vm0, %v1423_v4  ;;  %1158 = vmatpush3.bf16.msra.mxu0 %v1566_v41  ;;  %v289_v44 = vmul.f32 %v279_v40, %v1542_v0  ;;  %v280_v45 = vsub.f32 %v271_v42, %v1644_v36 }
  0xaa   :  { %1159 = vmatprep.subr.bf16.mxu0 %v1421_v2  ;;  %v272_v46 = vmin.f32 %v263_v43, 255.0 }
  0xab   :  { %v290_v47 = vmul.f32 %v280_v45, %v1542_v0 }
  0xac   :  { %967 = vmatmul.mubr.f32.gmra.mrb[2].mxu0 %v284_v10  ;;  %v281_v49 = vsub.f32 %v272_v46, %v1644_v36 }
  0xad   :  { %969 = vmatprep.mubr.msk.f32.mxu0 %vm1422_vm0, %v1423_v4  ;;  %1161 = vmatpush3.bf16.msra.mxu0 %v1572_v48 }
  0xae   :  { %1162 = vmatprep.subr.bf16.mxu0 %v1421_v2  ;;  %v291_v50 = vmul.f32 %v281_v49, %v1542_v0 }
  0xb0   :  { %970 = vmatmul.mubr.f32.gmra.mrb[4].mxu0 %v285_v21 }
  0xb1   :  { %972 = vmatprep.mubr.msk.f32.mxu0 %vm1422_vm0, %v1423_v4  ;;  %1164 = vmatpush3.bf16.msra.mxu0 %v1580_v58 }
  0xb2   :  { %1165 = vmatprep.subr.bf16.mxu0 %v1421_v2 }
  0xb4   :  { %973 = vmatmul.mubr.f32.gmra.mrb[6].mxu0 %v286_v28 }
  0xb5   :  { %975 = vmatprep.mubr.msk.f32.mxu0 %vm1422_vm0, %v1423_v4  ;;  %1167 = vmatpush3.bf16.msra.mxu0 %v1586_v62 }
  0xb6   :  { %1168 = vmatprep.subr.bf16.mxu0 %v1421_v2 }
  0xb8   :  { %976 = vmatmul.mubr.f32.gmra.mrb[8].mxu0 %v287_v34 }
  0xb9   :  { %978 = vmatprep.mubr.msk.f32.mxu0 %vm1422_vm0, %v1423_v4  ;;  %1170 = vmatpush3.bf16.msra.mxu0 %v1600_v13 }
  0xba   :  { %1171 = vmatprep.subr.bf16.mxu0 %v1421_v2 }
  0xbc   :  { %979 = vmatmul.mubr.f32.gmra.mrb[10].mxu0 %v288_v39 }
  0xbd   :  { %981 = vmatprep.mubr.msk.f32.mxu0 %vm1422_vm0, %v1423_v4  ;;  %1173 = vmatpush3.bf16.msra.mxu0 %v1609_v18 }
  0xbe   :  { %1174 = vmatprep.subr.bf16.mxu0 %v1421_v2 }
  0xc0   :  { %982 = vmatmul.mubr.f32.gmra.mrb[12].mxu0 %v289_v44 }
  0xc1   :  { %984 = vmatprep.mubr.msk.f32.mxu0 %vm1422_vm0, %v1423_v4  ;;  %1176 = vmatpush3.bf16.msra.mxu0 %v1618_v24 }
  0xc2   :  { %1177 = vmatprep.subr.bf16.mxu0 %v1421_v2 }
  0xc4   :  { %985 = vmatmul.mubr.f32.gmra.mrb[14].mxu0 %v290_v47 }
  0xc5   :  { %987 = vmatprep.mubr.msk.f32.mxu0 %vm1422_vm0, %v1423_v4  ;;  %1179 = vmatpush3.bf16.msra.mxu0 %v1626_v19 }
  0xc8   :  { %988 = vmatmul.mubr.f32.gmra.mrb[16].mxu0 %v291_v50 }
  0xc9   :  { %1081 = vmatprep.mubr.msk.f32.mxu0 %vm1422_vm0, %v1423_v4 }
 0x17b   :  { %v364_v52 = vpop.f32.mrb[0].mxu0 }
 0x17c   :  { %v365_v53 = vadd.f32 %v1711_v51, %v364_v52  ;;  %v965_v54 = vpop.f32.mrb[1].mxu0 }
 0x17e   :  { %v408_v55 = vmul.f32 %v365_v53, %v1638_v30 }
 0x17f   :  { %v369_v56 = vpop.f32.mrb[2].mxu0 }
 0x180   :  { %v1207_v57 = vround.rtne.f32 %v408_v55  ;;  %v370_v59 = vadd.f32 %v1711_v51, %v369_v56  ;;  %v968_v60 = vpop.f32.mrb[3].mxu0 }
 0x182   :  { %v426_v61 = vadd.f32 %v1207_v57, %v1644_v36  ;;  %v409_v63 = vmul.f32 %v370_v59, %v1638_v30 }
 0x183   :  { %v374_v1 = vpop.f32.mrb[4].mxu0 }
 0x184   :  { %v435_v3 = vmax.f32 %v426_v61, 0.0  ;;  %v1208_v5 = vround.rtne.f32 %v409_v63  ;;  %v375_v6 = vadd.f32 %v1711_v51, %v374_v1  ;;  %v971_v7 = vpop.f32.mrb[5].mxu0 }
 0x186   :  { %v444_v8 = vmin.f32 %v435_v3, 255.0  ;;  %v427_v9 = vadd.f32 %v1208_v5, %v1644_v36  ;;  %v410_v10 = vmul.f32 %v375_v6, %v1638_v30 }
 0x187   :  { %v379_v11 = vpop.f32.mrb[6].mxu0 }
 0x188   :  { %v436_v12 = vmax.f32 %v427_v9, 0.0  ;;  %v1209_v14 = vround.rtne.f32 %v410_v10  ;;  %v380_v15 = vadd.f32 %v1711_v51, %v379_v11  ;;  %v974_v16 = vpop.f32.mrb[7].mxu0  ;;  %v453_v17 = vsub.f32 %v444_v8, %v1644_v36 }
 0x18a   :  { %v445_v20 = vmin.f32 %v436_v12, 255.0  ;;  %v428_v21 = vadd.f32 %v1209_v14, %v1644_v36  ;;  %v411_v23 = vmul.f32 %v380_v15, %v1638_v30  ;;  %v462_v25 = vmul.f32 %v453_v17, %v1542_v0 }
 0x18b   :  { %v384_v26 = vpop.f32.mrb[8].mxu0 }
 0x18c   :  { %v437_v22 = vmax.f32 %v428_v21, 0.0  ;;  %v1210_v27 = vround.rtne.f32 %v411_v23  ;;  %v385_v28 = vadd.f32 %v1711_v51, %v384_v26  ;;  %v977_v29 = vpop.f32.mrb[9].mxu0  ;;  %1023 = vmatmul.mubr.f32.vlgmr.msra.gmra.mrb[0].mxu1 %v462_v25  ;;  %v454_v31 = vsub.f32 %v445_v20, %v1644_v36 }
 0x18d   :  { %1025 = vmatprep.mubr.msk.f32.mxu1 %vm1422_vm0, %v1423_v4  ;;  %1188 = vmatpush3.bf16.msra.mxu1 %v1566_v41 }
 0x18e   :  { %v446_v32 = vmin.f32 %v437_v22, 255.0  ;;  %v429_v33 = vadd.f32 %v1210_v27, %v1644_v36  ;;  %v412_v34 = vmul.f32 %v385_v28, %v1638_v30  ;;  %v463_v35 = vmul.f32 %v454_v31, %v1542_v0  ;;  %1181 = vmatprep.subr.bf16.mxu1 %v1421_v2 }
 0x18f   :  { %v389_v37 = vpop.f32.mrb[10].mxu0 }
 0x190   :  { %v438_v38 = vmax.f32 %v429_v33, 0.0  ;;  %v1211_v39 = vround.rtne.f32 %v412_v34  ;;  %v390_v40 = vadd.f32 %v1711_v51, %v389_v37  ;;  %v980_v42 = vpop.f32.mrb[11].mxu0  ;;  %1026 = vmatmul.mubr.f32.gmra.mrb[2].mxu1 %v463_v35  ;;  %v455_v43 = vsub.f32 %v446_v32, %v1644_v36 }
 0x191   :  { %1028 = vmatprep.mubr.msk.f32.mxu1 %vm1422_vm0, %v1423_v4  ;;  %1189 = vmatpush3.bf16.msra.mxu1 %v1572_v48 }
 0x192   :  { %v447_v41 = vmin.f32 %v438_v38, 255.0  ;;  %v430_v44 = vadd.f32 %v1211_v39, %v1644_v36  ;;  %v413_v45 = vmul.f32 %v390_v40, %v1638_v30  ;;  %v464_v46 = vmul.f32 %v455_v43, %v1542_v0  ;;  %1182 = vmatprep.subr.bf16.mxu1 %v1421_v2 }
 0x193   :  { %v394_v47 = vpop.f32.mrb[12].mxu0 }
 0x194   :  { %v439_v49 = vmax.f32 %v430_v44, 0.0  ;;  %v1212_v50 = vround.rtne.f32 %v413_v45  ;;  %v395_v52 = vadd.f32 %v1711_v51, %v394_v47  ;;  %v983_v53 = vpop.f32.mrb[13].mxu0  ;;  %1029 = vmatmul.mubr.f32.gmra.mrb[4].mxu1 %v464_v46  ;;  %v456_v54 = vsub.f32 %v447_v41, %v1644_v36 }
 0x195   :  { %1031 = vmatprep.mubr.msk.f32.mxu1 %vm1422_vm0, %v1423_v4  ;;  %1190 = vmatpush3.bf16.msra.mxu1 %v1580_v58 }
 0x196   :  { %v448_v48 = vmin.f32 %v439_v49, 255.0  ;;  %v431_v55 = vadd.f32 %v1212_v50, %v1644_v36  ;;  %v414_v56 = vmul.f32 %v395_v52, %v1638_v30  ;;  %v465_v57 = vmul.f32 %v456_v54, %v1542_v0  ;;  %1183 = vmatprep.subr.bf16.mxu1 %v1421_v2 }
 0x197   :  { %v399_v59 = vpop.f32.mrb[14].mxu0 }
 0x198   :  { %v440_v60 = vmax.f32 %v431_v55, 0.0  ;;  %v1213_v61 = vround.rtne.f32 %v414_v56  ;;  %v400_v63 = vadd.f32 %v1711_v51, %v399_v59  ;;  %v986_v1 = vpop.f32.mrb[15].mxu0  ;;  %1032 = vmatmul.mubr.f32.gmra.mrb[6].mxu1 %v465_v57  ;;  %v457_v3 = vsub.f32 %v448_v48, %v1644_v36 }
 0x199   :  { %1034 = vmatprep.mubr.msk.f32.mxu1 %vm1422_vm0, %v1423_v4  ;;  %1191 = vmatpush3.bf16.msra.mxu1 %v1586_v62 }
 0x19a   :  { %v449_v58 = vmin.f32 %v440_v60, 255.0  ;;  %v432_v5 = vadd.f32 %v1213_v61, %v1644_v36  ;;  %v415_v6 = vmul.f32 %v400_v63, %v1638_v30  ;;  %v466_v7 = vmul.f32 %v457_v3, %v1542_v0  ;;  %1184 = vmatprep.subr.bf16.mxu1 %v1421_v2 }
 0x19b   :  { %v404_v8 = vpop.f32.mrb[16].mxu0 }
 0x19c   :  { %v441_v9 = vmax.f32 %v432_v5, 0.0  ;;  %v1214_v10 = vround.rtne.f32 %v415_v6  ;;  %v405_v11 = vadd.f32 %v1711_v51, %v404_v8  ;;  %v989_v12 = vpop.f32.mrb[17].mxu0  ;;  %1035 = vmatmul.mubr.f32.gmra.mrb[8].mxu1 %v466_v7  ;;  %v458_v14 = vsub.f32 %v449_v58, %v1644_v36 }
 0x19d   :  { %1037 = vmatprep.mubr.msk.f32.mxu1 %vm1422_vm0, %v1423_v4  ;;  %1192 = vmatpush3.bf16.msra.mxu1 %v1600_v13 }
 0x19e   :  { %v450_v62 = vmin.f32 %v441_v9, 255.0  ;;  %v433_v15 = vadd.f32 %v1214_v10, %v1644_v36  ;;  %v416_v16 = vmul.f32 %v405_v11, %v1638_v30  ;;  %v467_v17 = vmul.f32 %v458_v14, %v1542_v0  ;;  %1185 = vmatprep.subr.bf16.mxu1 %v1421_v2 }
 0x1a0   :  { %v442_v20 = vmax.f32 %v433_v15, 0.0  ;;  %v1215_v21 = vround.rtne.f32 %v416_v16  ;;  %1038 = vmatmul.mubr.f32.gmra.mrb[10].mxu1 %v467_v17  ;;  %v459_v23 = vsub.f32 %v450_v62, %v1644_v36 }
 0x1a1   :  { %1040 = vmatprep.mubr.msk.f32.mxu1 %vm1422_vm0, %v1423_v4  ;;  %1193 = vmatpush3.bf16.msra.mxu1 %v1609_v18 }
 0x1a2   :  { %v451_v13 = vmin.f32 %v442_v20, 255.0  ;;  %v434_v25 = vadd.f32 %v1215_v21, %v1644_v36  ;;  %v468_v26 = vmul.f32 %v459_v23, %v1542_v0  ;;  %1186 = vmatprep.subr.bf16.mxu1 %v1421_v2 }
 0x1a4   :  { %v443_v22 = vmax.f32 %v434_v25, 0.0  ;;  %1041 = vmatmul.mubr.f32.gmra.mrb[12].mxu1 %v468_v26  ;;  %v460_v27 = vsub.f32 %v451_v13, %v1644_v36 }
 0x1a5   :  { %1043 = vmatprep.mubr.msk.f32.mxu1 %vm1422_vm0, %v1423_v4  ;;  %1194 = vmatpush3.bf16.msra.mxu1 %v1618_v24 }
 0x1a6   :  { %v452_v28 = vmin.f32 %v443_v22, 255.0  ;;  %v469_v29 = vmul.f32 %v460_v27, %v1542_v0  ;;  %1187 = vmatprep.subr.bf16.mxu1 %v1421_v2 }
 0x1a8   :  { %1044 = vmatmul.mubr.f32.gmra.mrb[14].mxu1 %v469_v29  ;;  %v461_v18 = vsub.f32 %v452_v28, %v1644_v36 }
 0x1a9   :  { %1046 = vmatprep.mubr.msk.f32.mxu1 %vm1422_vm0, %v1423_v4  ;;  %1195 = vmatpush3.bf16.msra.mxu1 %v1626_v19 }
 0x1aa   :  { %v470_v31 = vmul.f32 %v461_v18, %v1542_v0 }
 0x1ac   :  { %1047 = vmatmul.mubr.f32.gmra.mrb[16].mxu1 %v470_v31 }
 0x1ad   :  { %1096 = vmatprep.mubr.msk.f32.mxu1 %vm1422_vm0, %v1423_v4 }
 0x25f   :  { %v537_v24 = vpop.f32.mrb[0].mxu1 }
 0x260   :  { %v538_v32 = vadd.f32 %v1711_v51, %v537_v24  ;;  %v1024_v33 = vpop.f32.mrb[1].mxu1 }
 0x262   :  { %v581_v34 = vmax.f32 %v538_v32, 0.0 }
 0x263   :  { %v542_v2 = vpop.f32.mrb[2].mxu1 }
 0x264   :  { %v590_v35 = vmul.f32 %v581_v34, %v1638_v30  ;;  %v543_v37 = vadd.f32 %v1711_v51, %v542_v2  ;;  %v1027_v38 = vpop.f32.mrb[3].mxu1 }
 0x266   :  { %v1216_v39 = vround.rtne.f32 %v590_v35  ;;  %v582_v40 = vmax.f32 %v543_v37, 0.0 }
 0x267   :  { %v547_v19 = vpop.f32.mrb[4].mxu1 }
 0x268   :  { %v608_v42 = vadd.f32 %v1216_v39, %v1644_v36  ;;  %v591_v43 = vmul.f32 %v582_v40, %v1638_v30  ;;  %v548_v41 = vadd.f32 %v1711_v51, %v547_v19  ;;  %v1030_v44 = vpop.f32.mrb[5].mxu1 }
 0x26a   :  { %v617_v45 = vmax.f32 %v608_v42, 0.0  ;;  %v1217_v46 = vround.rtne.f32 %v591_v43  ;;  %v583_v47 = vmax.f32 %v548_v41, 0.0 }
 0x26b   :  { %v552_v49 = vpop.f32.mrb[6].mxu1 }
 0x26c   :  { %v626_v50 = vmin.f32 %v617_v45, 255.0  ;;  %v609_v52 = vadd.f32 %v1217_v46, %v1644_v36  ;;  %v592_v53 = vmul.f32 %v583_v47, %v1638_v30  ;;  %v553_v54 = vadd.f32 %v1711_v51, %v552_v49  ;;  %v1033_v48 = vpop.f32.mrb[7].mxu1 }
 0x26e   :  { %v635_v55 = vsub.f32 %v626_v50, %v1644_v36  ;;  %v618_v56 = vmax.f32 %v609_v52, 0.0  ;;  %v1218_v57 = vround.rtne.f32 %v592_v53  ;;  %v584_v59 = vmax.f32 %v553_v54, 0.0 }
 0x26f   :  { %v557_v60 = vpop.f32.mrb[8].mxu1 }
 0x270   :  { %v644_v61 = vmul.f32 %v635_v55, %v1542_v0  ;;  %v627_v63 = vmin.f32 %v618_v56, 255.0  ;;  %v610_v1 = vadd.f32 %v1218_v57, %v1644_v36  ;;  %v593_v3 = vmul.f32 %v584_v59, %v1638_v30  ;;  %v1036_v58 = vpop.f32.mrb[9].mxu1 }
 0x271   :  { %v558_v5 = vadd.f32 %v1711_v51, %v557_v60 }
 0x272   :  { %v619_v6 = vmax.f32 %v610_v1, 0.0  ;;  %v1219_v7 = vround.rtne.f32 %v593_v3  ;;  %1082 = vmatmul.mubr.f32.vlgmr.msra.gmra.mrb[18].mxu0 %v644_v61  ;;  %v636_v8 = vsub.f32 %v627_v63, %v1644_v36 }
 0x273   :  { %v585_v9 = vmax.f32 %v558_v5, 0.0  ;;  %v562_v10 = vpop.f32.mrb[10].mxu1  ;;  %1084 = vmatprep.mubr.msk.f32.mxu0 %vm1422_vm0, %v1423_v4 }
 0x274   :  { %v628_v11 = vmin.f32 %v619_v6, 255.0  ;;  %v611_v12 = vadd.f32 %v1219_v7, %v1644_v36  ;;  %v563_v14 = vadd.f32 %v1711_v51, %v562_v10  ;;  %v1039_v62 = vpop.f32.mrb[11].mxu1  ;;  %v645_v15 = vmul.f32 %v636_v8, %v1542_v0 }
 0x275   :  { %v594_v16 = vmul.f32 %v585_v9, %v1638_v30 }
 0x276   :  { %v620_v17 = vmax.f32 %v611_v12, 0.0  ;;  %v586_v20 = vmax.f32 %v563_v14, 0.0  ;;  %1085 = vmatmul.mubr.f32.gmra.mrb[20].mxu0 %v645_v15  ;;  %v637_v21 = vsub.f32 %v628_v11, %v1644_v36 }
 0x277   :  { %v1220_v23 = vround.rtne.f32 %v594_v16  ;;  %v567_v13 = vpop.f32.mrb[12].mxu1  ;;  %1087 = vmatprep.mubr.msk.f32.mxu0 %vm1422_vm0, %v1423_v4 }
 0x278   :  { %v629_v25 = vmin.f32 %v620_v17, 255.0  ;;  %v595_v26 = vmul.f32 %v586_v20, %v1638_v30  ;;  %v568_v22 = vadd.f32 %v1711_v51, %v567_v13  ;;  %v1042_v27 = vpop.f32.mrb[13].mxu1  ;;  %v646_v28 = vmul.f32 %v637_v21, %v1542_v0 }
 0x279   :  { %v612_v29 = vadd.f32 %v1220_v23, %v1644_v36 }
 0x27a   :  { %v1221_v18 = vround.rtne.f32 %v595_v26  ;;  %v587_v31 = vmax.f32 %v568_v22, 0.0  ;;  %1088 = vmatmul.mubr.f32.gmra.mrb[22].mxu0 %v646_v28  ;;  %v638_v24 = vsub.f32 %v629_v25, %v1644_v36 }
 0x27b   :  { %v621_v32 = vmax.f32 %v612_v29, 0.0  ;;  %v572_v33 = vpop.f32.mrb[14].mxu1  ;;  %1090 = vmatprep.mubr.msk.f32.mxu0 %vm1422_vm0, %v1423_v4 }
 0x27c   :  { %v613_v34 = vadd.f32 %v1221_v18, %v1644_v36  ;;  %v596_v2 = vmul.f32 %v587_v31, %v1638_v30  ;;  %v573_v35 = vadd.f32 %v1711_v51, %v572_v33  ;;  %v1045_v37 = vpop.f32.mrb[15].mxu1  ;;  %v647_v38 = vmul.f32 %v638_v24, %v1542_v0 }
 0x27d   :  { %v630_v39 = vmin.f32 %v621_v32, 255.0 }
 0x27e   :  { %v622_v40 = vmax.f32 %v613_v34, 0.0  ;;  %v1222_v19 = vround.rtne.f32 %v596_v2  ;;  %v588_v42 = vmax.f32 %v573_v35, 0.0  ;;  %1091 = vmatmul.mubr.f32.gmra.mrb[24].mxu0 %v647_v38 }
 0x27f   :  { %v577_v43 = vpop.f32.mrb[16].mxu1  ;;  %1093 = vmatprep.mubr.msk.f32.mxu0 %vm1422_vm0, %v1423_v4  ;;  %v639_v41 = vsub.f32 %v630_v39, %v1644_v36 }
 0x280   :  { %v631_v44 = vmin.f32 %v622_v40, 255.0  ;;  %v614_v45 = vadd.f32 %v1222_v19, %v1644_v36  ;;  %v597_v46 = vmul.f32 %v588_v42, %v1638_v30  ;;  %v578_v47 = vadd.f32 %v1711_v51, %v577_v43  ;;  %v1048_v49 = vpop.f32.mrb[17].mxu1 }
 0x281   :  { %v648_v50 = vmul.f32 %v639_v41, %v1542_v0 }
 0x282   :  { %v640_v52 = vsub.f32 %v631_v44, %v1644_v36  ;;  %v623_v53 = vmax.f32 %v614_v45, 0.0  ;;  %v1223_v54 = vround.rtne.f32 %v597_v46  ;;  %v589_v48 = vmax.f32 %v578_v47, 0.0 }
 0x283   :  { %1094 = vmatmul.mubr.f32.gmra.mrb[26].mxu0 %v648_v50 }
 0x284   :  { %v649_v55 = vmul.f32 %v640_v52, %v1542_v0  ;;  %v632_v56 = vmin.f32 %v623_v53, 255.0  ;;  %v615_v57 = vadd.f32 %v1223_v54, %v1644_v36  ;;  %v598_v59 = vmul.f32 %v589_v48, %v1638_v30 }
 0x286   :  { %v624_v60 = vmax.f32 %v615_v57, 0.0  ;;  %v1224_v61 = vround.rtne.f32 %v598_v59  ;;  %1097 = vmatmul.mubr.f32.vlgmr.msra.gmra.mrb[18].mxu1 %v649_v55  ;;  %v641_v63 = vsub.f32 %v632_v56, %v1644_v36 }
 0x287   :  { %1099 = vmatprep.mubr.msk.f32.mxu1 %vm1422_vm0, %v1423_v4 }
 0x288   :  { %v633_v1 = vmin.f32 %v624_v60, 255.0  ;;  %v616_v3 = vadd.f32 %v1224_v61, %v1644_v36  ;;  %v650_v58 = vmul.f32 %v641_v63, %v1542_v0 }
 0x28a   :  { %v625_v5 = vmax.f32 %v616_v3, 0.0  ;;  %1100 = vmatmul.mubr.f32.gmra.mrb[20].mxu1 %v650_v58  ;;  %v642_v6 = vsub.f32 %v633_v1, %v1644_v36 }
 0x28b   :  { %1102 = vmatprep.mubr.msk.f32.mxu1 %vm1422_vm0, %v1423_v4 }
 0x28c   :  { %v634_v30 = vmin.f32 %v625_v5, 255.0  ;;  %v651_v7 = vmul.f32 %v642_v6, %v1542_v0 }
 0x28e   :  { %1103 = vmatmul.mubr.f32.gmra.mrb[22].mxu1 %v651_v7  ;;  %v643_v8 = vsub.f32 %v634_v30, %v1644_v36 }
 0x28f   :  { %1105 = vmatprep.mubr.msk.f32.mxu1 %vm1422_vm0, %v1423_v4 }
 0x290   :  { %v652_v9 = vmul.f32 %v643_v8, %v1542_v0 }
 0x292   :  { %1106 = vmatmul.mubr.f32.gmra.mrb[24].mxu1 %v652_v9 }
 0x345   :  { %v719_v10 = vpop.f32.mrb[18].mxu0 }
 0x346   :  { %v720_v11 = vadd.f32 %v1711_v51, %v719_v10  ;;  %v1083_v12 = vpop.f32.mrb[19].mxu0 }
 0x348   :  { %v847_v14 = vmul.f32 -1.442695, %v720_v11 }
 0x349   :  { %v724_v62 = vpop.f32.mrb[20].mxu0 }
 0x34a   :  { %1238 = vpow2.f32 %v847_v14  ;;  %v725_v15 = vadd.f32 %v1711_v51, %v724_v62  ;;  %v1086_v16 = vpop.f32.mrb[21].mxu0 }
 0x34c   :  { %v848_v17 = vmul.f32 -1.442695, %v725_v15 }
 0x34d   :  { %v729_v20 = vpop.f32.mrb[22].mxu0 }
 0x34e   :  { %1240 = vpow2.f32 %v848_v17  ;;  %v730_v36 = vadd.f32 %v1711_v51, %v729_v20  ;;  %v1089_v21 = vpop.f32.mrb[23].mxu0 }
 0x350   :  { %v849_v4 = vmul.f32 -1.442695, %v730_v36 }
 0x351   :  { %v734_v23 = vpop.f32.mrb[24].mxu0 }
 0x352   :  { %1242 = vpow2.f32 %v849_v4  ;;  %v735_v0 = vadd.f32 %v1711_v51, %v734_v23  ;;  %v1092_v13 = vpop.f32.mrb[25].mxu0 }
 0x354   :  { %v1239_v25 = vpop.eup %1238  ;;  %v850_v26 = vmul.f32 -1.442695, %v735_v0 }
 0x355   :  { %v790_v22 = vadd.f32 1.0, %v1239_v25 }
 0x356   :  { %1244 = vpow2.f32 %v850_v26  ;;  %v739_v27 = vpop.f32.mrb[26].mxu0 }
 0x357   :  { %1246 = vrcp.f32 %v790_v22  ;;  %v740_v28 = vadd.f32 %v1711_v51, %v739_v27  ;;  %v1095_v29 = vpop.f32.mrb[27].mxu0 }
 0x358   :  { %v1241_v18 = vpop.eup %1240 }
 0x359   :  { %v791_v31 = vadd.f32 1.0, %v1241_v18  ;;  %v851_v24 = vmul.f32 -1.442695, %v740_v28  ;;  %v744_v32 = vpop.f32.mrb[18].mxu1 }
 0x35a   :  { %v745_v33 = vadd.f32 %v1711_v51, %v744_v32  ;;  %v1098_v34 = vpop.f32.mrb[19].mxu1 }
 0x35b   :  { %1248 = vrcp.f32 %v791_v31 }
 0x35c   :  { %v1243_v2 = vpop.eup %1242  ;;  %1250 = vpow2.f32 %v851_v24  ;;  %v852_v35 = vmul.f32 -1.442695, %v745_v33 }
 0x35d   :  { %v792_v37 = vadd.f32 1.0, %v1243_v2  ;;  %v749_v38 = vpop.f32.mrb[20].mxu1 }
 0x35e   :  { %1252 = vpow2.f32 %v852_v35  ;;  %v750_v39 = vadd.f32 %v1711_v51, %v749_v38  ;;  %v1101_v40 = vpop.f32.mrb[21].mxu1 }
 0x35f   :  { %1254 = vrcp.f32 %v792_v37 }
 0x360   :  { %v1245_v19 = vpop.eup %1244  ;;  %v853_v42 = vmul.f32 -1.442695, %v750_v39 }
 0x361   :  { %v1247_v43 = vpop.eup %1246  ;;  %v793_v41 = vadd.f32 1.0, %v1245_v19  ;;  %v754_v44 = vpop.f32.mrb[22].mxu1 }
 0x362   :  { %817 = vst [vmem:[#allocation14] sm:$0xff] %v1247_v43  ;;  %1256 = vpow2.f32 %v853_v42  ;;  %v755_v45 = vadd.f32 %v1711_v51, %v754_v44  ;;  %v1104_v46 = vpop.f32.mrb[23].mxu1 }
 0x363   :  { %1258 = vrcp.f32 %v793_v41 }
 0x364   :  { %v854_v47 = vmul.f32 -1.442695, %v755_v45 }
 0x365   :  { %v1249_v49 = vpop.eup %1248  ;;  %v759_v50 = vpop.f32.mrb[24].mxu1 }
 0x366   :  { %v1251_v52 = vpop.eup %1250  ;;  %818 = vst [vmem:[#allocation14 + $0x8] sm:$0xff] %v1249_v49  ;;  %1260 = vpow2.f32 %v854_v47  ;;  %v760_v53 = vadd.f32 %v1711_v51, %v759_v50  ;;  %v1107_v54 = vpop.f32.mrb[25].mxu1 }
 0x367   :  { %v794_v48 = vadd.f32 1.0, %v1251_v52 }
 0x368   :  { %v1253_v55 = vpop.eup %1252  ;;  %v855_v56 = vmul.f32 -1.442695, %v760_v53 }
 0x369   :  { %v1255_v57 = vpop.eup %1254  ;;  %1262 = vrcp.f32 %v794_v48  ;;  %v795_v59 = vadd.f32 1.0, %v1253_v55 }
 0x36a   :  { %819 = vst [vmem:[#allocation14 + $0x10] sm:$0xff] %v1255_v57  ;;  %1264 = vpow2.f32 %v855_v56 }
 0x36b   :  { %1266 = vrcp.f32 %v795_v59 }
 0x36c   :  { %v1257_v60 = vpop.eup %1256 }
 0x36d   :  { %v1259_v61 = vpop.eup %1258  ;;  %v796_v63 = vadd.f32 1.0, %v1257_v60 }
 0x36e   :  { %820 = vst [vmem:[#allocation14 + $0x18] sm:$0xff] %v1259_v61 }
 0x36f   :  { %1268 = vrcp.f32 %v796_v63 }
 0x370   :  { %v1261_v1 = vpop.eup %1260 }
 0x371   :  { %v797_v3 = vadd.f32 1.0, %v1261_v1 }
 0x373   :  { %v1263_v58 = vpop.eup %1262  ;;  %1270 = vrcp.f32 %v797_v3 }
 0x374   :  { %v1265_v51 = vpop.eup %1264  ;;  %821 = vst [vmem:[#allocation14 + $0x20] sm:$0xff] %v1263_v58 }
 0x375   :  { %v1267_v5 = vpop.eup %1266  ;;  %v798_v6 = vadd.f32 1.0, %v1265_v51 }
 0x376   :  { %822 = vst [vmem:[#allocation14 + $0x28] sm:$0xff] %v1267_v5 }
 0x377   :  { %1272 = vrcp.f32 %v798_v6 }
 0x379   :  { %v1269_v30 = vpop.eup %1268 }
 0x37a   :  { %823 = vst [vmem:[#allocation14 + $0x30] sm:$0xff] %v1269_v30 }
 0x37d   :  { %v1271_v7 = vpop.eup %1270 }
 0x37e   :  { %824 = vst [vmem:[#allocation14 + $0x38] sm:$0xff] %v1271_v7 }
 0x381   :  { %v1273_v8 = vpop.eup %1272 }
 0x382   :  { %825 = vst [vmem:[#allocation14 + $0x40] sm:$0xff] %v1273_v8 }
 0x383   :  { %1395 = shalt.err (!%p1392_p2)
}
 0x384   :  { %s1396_s25 = scalar_lea.hbm %s1881_s7, 1152 }
 0x385   :  { %p1397_p3 = scmp.ne.s32.totalorder %s1881_s7, %s1396_s25  ;;  %p1400_p4 = scmp.lt.u32.totalorder %s1396_s25, %s1881_s7 }
 0x387   :  { %p1402_p5 = pnand %p1400_p4, %p1397_p3 }
 0x389   :  { %1405 = shalt.err (!%p1402_p5)
}
 0x38a   :  { %837 = dma.vmem_to_hbm [thread:$0]  %s832_s22, 1152, %s1881_s7, [#allocation7], %s1416_s13, %s1416_s13, %s1417_s14  }
 0x38b   :  { %1412 = dma.done.wait [#allocation7], 1152  }
 0x38c   :  { %1413 = vsyncadd [#allocation7], 4294966144 }
 0x38d   :  { %841 = vsyncpa [#allocation6], 1 }
 0x38e   :  { %842 = vsyncpa [#allocation9], 1 }
 0x38f   :  { %843 = vsyncpa [#allocation12], 1 }
 0x390   :  { %844 = vsyncpa [#allocation7], 1 }

// kernel: tpu_custom_call.1
= control target key start
LH: loop header
LB: loop body
LE: loop exit
PB: predicated region body
PF: predicated region fallthrough
CT: control target
= control target key end

     0   :  { %14 = vsyncpa [#allocation6], 0  ;;  %s1874_s0 = inlined_call_operand.hbm [shape: f32[72,128], index: 0, kind: input, shape index: {}]   ;;  %s1875_s1 = inlined_call_operand.hbm [shape: s8[128,128], index: 1, kind: input, shape index: {}]   ;;  %s1876_s2 = inlined_call_operand.hbm [shape: f32[1,128], index: 2, kind: input, shape index: {}]   ;;  %s1877_s3 = inlined_call_operand.<no memory space> [shape: f32[1,1], index: 3, kind: input, shape index: {}]   ;;  %s1878_s4 = inlined_call_operand.<no memory space> [shape: s32[1,1], index: 4, kind: input, shape index: {}]   ;;  %s1879_s5 = inlined_call_operand.hbm [shape: f32[1,128], index: 5, kind: input, shape index: {}]   ;;  %s1880_s6 = inlined_call_operand.hbm [shape: s32[1,128], index: 6, kind: input, shape index: {}]   ;;  %s1881_s7 = inlined_call_operand.hbm [shape: f32[72,128], index: 7, kind: output, shape index: {}]  }
   0x1   :  { %15 = vsyncpa [#allocation9], 0 }
   0x2   :  { %16 = vsyncpa [#allocation12], 0 }
   0x3   :  { %17 = vsyncpa [#allocation7], 0  ;;  %s1414_s24 = smov [#allocation8]   ;;  %s1415_s26 = smov [#allocation11]  }
   0x4   :  { %s35_s25 = sshll.u32 %s1414_s24, 4  ;;  %s62_s27 = sshll.u32 %s1415_s26, 4  ;;  %s36_s25 = int_to_ptr.vmem [resolvable:$true] %s35_s25  ;;  %s1465_s27 = int_to_ptr.vmem [resolvable:$true] %s62_s27 }
   0x5   :  { %s1274_s30 = scalar_lea.hbm %s1875_s1, 512 }
   0x6   :  { %p1275_p0 = scmp.ne.s32.totalorder %s1875_s1, %s1274_s30  ;;  %p1278_p1 = scmp.lt.u32.totalorder %s1274_s30, %s1875_s1 }
   0x8   :  { %p1280_p2 = pnand %p1278_p1, %p1275_p0 }
   0xa   :  { %1283 = shalt.err (!%p1280_p2)
}
   0xb   :  { %s1284_s12 = scalar_lea.vmem %s36_s25, 512  ;;  %p1289_p4 = scmp.lt.s32.totalorder %s36_s25, %s36_s25 }
   0xc   :  { %p1285_p3 = scmp.ne.s32.totalorder %s36_s25, %s1284_s12  ;;  %p1290_p5 = scmp.lt.s32.totalorder %s1284_s12, %s1284_s12 }
   0xe   :  { %p1291_p6 = por %p1290_p5, %p1289_p4 }
  0x10   :  { %p1292_p7 = pnand %p1291_p6, %p1285_p3 }
  0x12   :  { %1295 = shalt.err (!%p1292_p7)
}
  0x13   :  { %s1416_s13 = smov 128   ;;  %s1417_s14 = smov 8  }
  0x14   :  { %41 = dma.hbm_to_vmem [thread:$0]  %s1875_s1, 512, %s36_s25, [#allocation9], %s1416_s13, %s1416_s13, %s1417_s14  }
  0x15   :  { %s1296_s19 = scalar_lea.hbm %s1879_s5, 16 }
  0x16   :  { %p1297_p8 = scmp.ne.s32.totalorder %s1879_s5, %s1296_s19  ;;  %p1300_p9 = scmp.lt.u32.totalorder %s1296_s19, %s1879_s5 }
  0x18   :  { %p1302_p10 = pnand %p1300_p9, %p1297_p8 }
  0x1a   :  { %1305 = shalt.err (!%p1302_p10)
}
  0x1b   :  { %s1306_s24 = scalar_lea.vmem %s1465_s27, 16  ;;  %s1310_s1 = scalar_lea.vmem %s1465_s27, 32 }
  0x1c   :  { %p1307_p11 = scmp.ne.s32.totalorder %s1465_s27, %s1306_s24  ;;  %p1311_p12 = scmp.lt.s32.totalorder %s1465_s27, %s1465_s27 }
  0x1d   :  { %p1312_p13 = scmp.lt.s32.totalorder %s1310_s1, %s1306_s24 }
  0x1f   :  { %p1313_p0 = por %p1312_p13, %p1311_p12 }
  0x21   :  { %p1314_p1 = pnand %p1313_p0, %p1307_p11 }
  0x23   :  { %1317 = shalt.err (!%p1314_p1)
}
  0x24   :  { %65 = dma.hbm_to_vmem [thread:$0]  %s1879_s5, 16, %s1465_s27, [#allocation12]  }
  0x25   :  { %s1418_s28 = smov [#allocation5]   ;;  %s1419_s30 = smov [#allocation10]  }
  0x26   :  { %s23_s29 = sshll.u32 %s1418_s28, 4  ;;  %s48_s8 = sshll.u32 %s1419_s30, 4  ;;  %s24_s29 = int_to_ptr.vmem [resolvable:$true] %s23_s29  ;;  %s49_s8 = int_to_ptr.vmem [resolvable:$true] %s48_s8 }
  0x27   :  { %s1318_s11 = scalar_lea.hbm %s1874_s0, 1152 }
  0x28   :  { %p1319_p2 = scmp.ne.s32.totalorder %s1874_s0, %s1318_s11  ;;  %p1322_p3 = scmp.lt.u32.totalorder %s1318_s11, %s1874_s0 }
  0x2a   :  { %p1324_p4 = pnand %p1322_p3, %p1319_p2 }
  0x2c   :  { %1327 = shalt.err (!%p1324_p4)
}
  0x2d   :  { %s1328_s5 = scalar_lea.vmem %s24_s29, 1152  ;;  %p1333_p6 = scmp.lt.s32.totalorder %s24_s29, %s24_s29 }
  0x2e   :  { %p1329_p5 = scmp.ne.s32.totalorder %s24_s29, %s1328_s5  ;;  %p1334_p7 = scmp.lt.s32.totalorder %s1328_s5, %s1328_s5 }
  0x30   :  { %p1335_p8 = por %p1334_p7, %p1333_p6 }
  0x32   :  { %p1336_p9 = pnand %p1335_p8, %p1329_p5 }
  0x34   :  { %1339 = shalt.err (!%p1336_p9)
}
  0x35   :  { %29 = dma.hbm_to_vmem [thread:$0]  %s1874_s0, 1152, %s24_s29, [#allocation6], %s1416_s13, %s1416_s13, %s1417_s14  }
  0x36   :  { %s1340_s21 = scalar_lea.hbm %s1876_s2, 16 }
  0x37   :  { %p1341_p10 = scmp.ne.s32.totalorder %s1876_s2, %s1340_s21  ;;  %p1344_p11 = scmp.lt.u32.totalorder %s1340_s21, %s1876_s2 }
  0x39   :  { %p1346_p12 = pnand %p1344_p11, %p1341_p10 }
  0x3b   :  { %1349 = shalt.err (!%p1346_p12)
}
  0x3c   :  { %s1350_s25 = scalar_lea.vmem %s49_s8, 16  ;;  %s1354_s26 = scalar_lea.vmem %s49_s8, 32 }
  0x3d   :  { %p1351_p13 = scmp.ne.s32.totalorder %s49_s8, %s1350_s25  ;;  %p1355_p0 = scmp.lt.s32.totalorder %s49_s8, %s49_s8 }
  0x3e   :  { %p1356_p1 = scmp.lt.s32.totalorder %s1354_s26, %s1350_s25 }
  0x40   :  { %p1357_p2 = por %p1356_p1, %p1355_p0 }
  0x42   :  { %p1358_p3 = pnand %p1357_p2, %p1351_p13 }
  0x44   :  { %1361 = shalt.err (!%p1358_p3)
}
  0x45   :  { %51 = dma.hbm_to_vmem [thread:$0]  %s1876_s2, 16, %s49_s8, [#allocation9]  }
  0x46   :  { %s1420_s29 = smov [#allocation13]   ;;  %s1362_s11 = scalar_lea.hbm %s1880_s6, 16 }
  0x47   :  { %s72_s30 = sshll.u32 %s1420_s29, 4  ;;  %p1363_p4 = scmp.ne.s32.totalorder %s1880_s6, %s1362_s11  ;;  %s73_s30 = int_to_ptr.vmem [resolvable:$true] %s72_s30 }
  0x48   :  { %p1366_p5 = scmp.lt.u32.totalorder %s1362_s11, %s1880_s6 }
  0x4a   :  { %p1368_p6 = pnand %p1366_p5, %p1363_p4 }
  0x4c   :  { %1371 = shalt.err (!%p1368_p6)
}
  0x4d   :  { %s1372_s5 = scalar_lea.vmem %s73_s30, 16  ;;  %s1376_s2 = scalar_lea.vmem %s73_s30, 32 }
  0x4e   :  { %p1373_p7 = scmp.ne.s32.totalorder %s73_s30, %s1372_s5  ;;  %p1377_p8 = scmp.lt.s32.totalorder %s73_s30, %s73_s30 }
  0x4f   :  { %p1378_p9 = scmp.lt.s32.totalorder %s1376_s2, %s1372_s5 }
  0x51   :  { %p1379_p10 = por %p1378_p9, %p1377_p8 }
  0x53   :  { %p1380_p11 = pnand %p1379_p10, %p1373_p7 }
  0x55   :  { %1383 = shalt.err (!%p1380_p11)
}
  0x56   :  { %75 = dma.hbm_to_vmem [thread:$0]  %s1880_s6, 16, %s73_s30, [#allocation12]  }
  0x57   :  { %1406 = dma.done.wait [#allocation6], 1152  }
  0x58   :  { %1407 = vsyncadd [#allocation6], 4294966144 }
  0x59   :  { %1408 = dma.done.wait [#allocation9], 528  }
  0x5a   :  { %1409 = vsyncadd [#allocation9], 4294966768  ;;  %v1542_v0 = vstv %s1877_s3 }
  0x5b   :  { %1410 = dma.done.wait [#allocation12], 32  }
  0x5c   :  { %1411 = vsyncadd [#allocation12], 4294967264  ;;  %v140_v1 = vlaneseq  ;;  %1236 = vrcp.f32 %v1542_v0  ;;  %v1421_v2 = vmov 0.0|0.0   ;;  %vm1422_vm0 = vmmov 0   ;;  %v101_v6 = vld [vmem:[#allocation8] sm:$0xff]  ;;  %v102_v12 = vld [vmem:[#allocation8 + $0x8] sm:$0xff]  ;;  %s96_s20 = scvt.s32.f32 %s1878_s4 }
  0x5d   :  { %1108 = vmatprep.subr.bf16.mxu0 %v1421_v2  ;;  %1132 = vmatprep.subr.bf16.mxu1 %v1421_v2  ;;  %v1423_v4 = vmov 0.0   ;;  %v137_v7 = vld [vmem:[#allocation13] sm:$0x1]  ;;  %v105_v8 = vunpack.c.0.s8 %v101_v6  ;;  %v106_v9 = vunpack.c.1.s8 %v101_v6  ;;  %v107_v11 = vunpack.c.2.s8 %v101_v6  ;;  %v1553_v22 = vld [vmem:[#allocation11] ss:$0 sm:$0xff]  ;;  %v103_v35 = vld [vmem:[#allocation8 + $0x10] sm:$0xff] }
  0x5e   :  { %v141_v3 = vshrl.u32 %v140_v1, 7  ;;  %963 = vmatprep.mubr.msk.f32.mxu0 %vm1422_vm0, %v1423_v4  ;;  %1022 = vmatprep.mubr.msk.f32.mxu1 %vm1422_vm0, %v1423_v4  ;;  %v138_v10 = vcvt.s32.f32 %v137_v7  ;;  %v108_v13 = vunpack.c.3.s8 %v101_v6  ;;  %v109_v14 = vunpack.c.0.s8 %v102_v12  ;;  %v104_v52 = vld [vmem:[#allocation8 + $0x18] sm:$0xff]  ;;  %s1424_s4 = smov [#allocation14]  }
  0x5f   :  { %v110_v15 = vunpack.c.1.s8 %v102_v12  ;;  %v111_v16 = vunpack.c.2.s8 %v102_v12  ;;  %v121_v17 = vcvt.s32.f32 %v105_v8  ;;  %v122_v18 = vcvt.s32.f32 %v106_v9  ;;  %s831_s22 = sshll.u32 %s1424_s4, 4  ;;  %s832_s22 = int_to_ptr.vmem [resolvable:$true] %s831_s22 }
  0x60   :  { %v142_v5 = vsub.s32 0, %v141_v3  ;;  %v123_v20 = vcvt.s32.f32 %v107_v11  ;;  %v124_v23 = vcvt.s32.f32 %v108_v13  ;;  %v125_v24 = vcvt.s32.f32 %v109_v14  ;;  %s1384_s23 = scalar_lea.vmem %s832_s22, 1152  ;;  %p1389_p13 = scmp.lt.s32.totalorder %s832_s22, %s832_s22 }
  0x61   :  { %v126_v25 = vcvt.s32.f32 %v110_v15  ;;  %v112_v26 = vunpack.c.3.s8 %v102_v12  ;;  %v127_v30 = vcvt.s32.f32 %v111_v16  ;;  %v113_v43 = vunpack.c.0.s8 %v103_v35  ;;  %p1385_p12 = scmp.ne.s32.totalorder %s832_s22, %s1384_s23  ;;  %p1390_p0 = scmp.lt.s32.totalorder %s1384_s23, %s1384_s23 }
  0x62   :  { %v1551_v19 = vrot.slane %v138_v10, %v142_v5  ;;  %v114_v44 = vunpack.c.1.s8 %v103_v35  ;;  %v115_v47 = vunpack.c.2.s8 %v103_v35  ;;  %v116_v51 = vunpack.c.3.s8 %v103_v35  ;;  %v221_v35 = vld [vmem:[#allocation5 + $0x20] sm:$0xff] }
  0x63   :  { %v128_v34 = vcvt.s32.f32 %v112_v26  ;;  %v129_v49 = vcvt.s32.f32 %v113_v43  ;;  %v117_v56 = vunpack.c.0.s8 %v104_v52  ;;  %v118_v57 = vunpack.c.1.s8 %v104_v52  ;;  %p1391_p1 = por %p1390_p0, %p1389_p13 }
  0x64   :  { %v145_v27 = vsub.f32 %v121_v17, %v1551_v19  ;;  %v146_v28 = vsub.f32 %v122_v18, %v1551_v19  ;;  %v147_v29 = vsub.f32 %v123_v20, %v1551_v19  ;;  %v148_v31 = vsub.f32 %v124_v23, %v1551_v19 }
  0x65   :  { %v149_v32 = vsub.f32 %v125_v24, %v1551_v19  ;;  %v150_v33 = vsub.f32 %v126_v25, %v1551_v19  ;;  %v151_v40 = vsub.f32 %v127_v30, %v1551_v19  ;;  %v152_v42 = vsub.f32 %v128_v34, %v1551_v19  ;;  %p1392_p2 = pnand %p1391_p1, %p1385_p12 }
  0x66   :  { %v1237_v21 = vpop.eup %1236  ;;  %v168_v36 = vmul.f32 %v1553_v22, %v145_v27  ;;  %v169_v37 = vmul.f32 %v1553_v22, %v146_v28  ;;  %v170_v38 = vmul.f32 %v1553_v22, %v147_v29  ;;  %v171_v39 = vmul.f32 %v1553_v22, %v148_v31  ;;  %v218_v27 = vld [vmem:[#allocation5 + $0x8] sm:$0xff]  ;;  %v219_v28 = vld [vmem:[#allocation5 + $0x10] sm:$0xff]  ;;  %v220_v29 = vld [vmem:[#allocation5 + $0x18] sm:$0xff] }
  0x67   :  { %1196 = vpush %v1237_v21  ;;  %v172_v45 = vmul.f32 %v1553_v22, %v149_v32  ;;  %v173_v46 = vmul.f32 %v1553_v22, %v150_v33  ;;  %v130_v50 = vcvt.s32.f32 %v114_v44  ;;  %v174_v53 = vmul.f32 %v1553_v22, %v151_v40 }
  0x68   :  { %v1566_v41 = vpack.c.bf16 %v169_v37, %v168_v36  ;;  %v1572_v48 = vpack.c.bf16 %v171_v39, %v170_v38  ;;  %v175_v54 = vmul.f32 %v1553_v22, %v152_v42  ;;  %v131_v55 = vcvt.s32.f32 %v115_v47 }
  0x69   :  { %v1580_v58 = vpack.c.bf16 %v173_v46, %v172_v45  ;;  %v153_v59 = vsub.f32 %v129_v49, %v1551_v19  ;;  %v154_v60 = vsub.f32 %v130_v50, %v1551_v19  ;;  %v132_v61 = vcvt.s32.f32 %v116_v51  ;;  %v222_v46 = vld [vmem:[#allocation5 + $0x28] sm:$0xff] }
  0x6a   :  { %1110 = vmatpush3.bf16.msra.mxu0 %v1566_v41  ;;  %1134 = vmatpush3.bf16.msra.mxu1 %v1566_v41  ;;  %v1586_v62 = vpack.c.bf16 %v175_v54, %v174_v53  ;;  %v155_v63 = vsub.f32 %v131_v55, %v1551_v19  ;;  %v133_v1 = vcvt.s32.f32 %v117_v56  ;;  %v134_v3 = vcvt.s32.f32 %v118_v57  ;;  %v223_v56 = vld [vmem:[#allocation5 + $0x30] sm:$0xff] }
  0x6b   :  { %1111 = vmatprep.subr.bf16.mxu0 %v1421_v2  ;;  %1135 = vmatprep.subr.bf16.mxu1 %v1421_v2  ;;  %v119_v5 = vunpack.c.2.s8 %v104_v52  ;;  %v176_v6 = vmul.f32 %v1553_v22, %v153_v59  ;;  %v177_v7 = vmul.f32 %v1553_v22, %v154_v60  ;;  %v156_v8 = vsub.f32 %v132_v61, %v1551_v19 }
  0x6c   :  { %v120_v9 = vunpack.c.3.s8 %v104_v52  ;;  %v178_v10 = vmul.f32 %v1553_v22, %v155_v63  ;;  %v157_v11 = vsub.f32 %v133_v1, %v1551_v19  ;;  %v158_v15 = vsub.f32 %v134_v3, %v1551_v19 }
  0x6d   :  { %v135_v12 = vcvt.s32.f32 %v119_v5  ;;  %v1600_v13 = vpack.c.bf16 %v177_v7, %v176_v6  ;;  %v179_v14 = vmul.f32 %v1553_v22, %v156_v8  ;;  %v1644_v36 = vstv %s96_s20  ;;  %v224_v6 = vld [vmem:[#allocation5 + $0x38] sm:$0xff] }
  0x6e   :  { %1113 = vmatpush3.bf16.msra.mxu0 %v1572_v48  ;;  %1137 = vmatpush3.bf16.msra.mxu1 %v1572_v48  ;;  %v136_v16 = vcvt.s32.f32 %v120_v9  ;;  %v180_v20 = vmul.f32 %v1553_v22, %v157_v11  ;;  %v181_v21 = vmul.f32 %v1553_v22, %v158_v15  ;;  %v225_v15 = vld [vmem:[#allocation5 + $0x40] sm:$0xff] }
  0x6f   :  { %1114 = vmatprep.subr.bf16.mxu0 %v1421_v2  ;;  %1138 = vmatprep.subr.bf16.mxu1 %v1421_v2  ;;  %v159_v17 = vsub.f32 %v135_v12, %v1551_v19  ;;  %v1609_v18 = vpack.c.bf16 %v179_v14, %v178_v10 }
  0x70   :  { %v160_v23 = vsub.f32 %v136_v16, %v1551_v19  ;;  %v1618_v24 = vpack.c.bf16 %v181_v21, %v180_v20 }
  0x71   :  { %v182_v25 = vmul.f32 %v1553_v22, %v159_v17 }
  0x72   :  { %1116 = vmatpush3.bf16.msra.mxu0 %v1580_v58  ;;  %1140 = vmatpush3.bf16.msra.mxu1 %v1580_v58  ;;  %v183_v26 = vmul.f32 %v1553_v22, %v160_v23  ;;  %v217_v22 = vld [vmem:[#allocation5] sm:$0xff] }
  0x73   :  { %1117 = vmatprep.subr.bf16.mxu0 %v1421_v2  ;;  %1141 = vmatprep.subr.bf16.mxu1 %v1421_v2 }
  0x74   :  { %v1626_v19 = vpack.c.bf16 %v183_v26, %v182_v25 }
  0x76   :  { %1119 = vmatpush3.bf16.msra.mxu0 %v1586_v62  ;;  %1143 = vmatpush3.bf16.msra.mxu1 %v1586_v62 }
  0x77   :  { %1120 = vmatprep.subr.bf16.mxu0 %v1421_v2  ;;  %1144 = vmatprep.subr.bf16.mxu1 %v1421_v2 }
  0x7a   :  { %1122 = vmatpush3.bf16.msra.mxu0 %v1600_v13  ;;  %1146 = vmatpush3.bf16.msra.mxu1 %v1600_v13 }
  0x7b   :  { %1123 = vmatprep.subr.bf16.mxu0 %v1421_v2  ;;  %1147 = vmatprep.subr.bf16.mxu1 %v1421_v2 }
  0x7e   :  { %1125 = vmatpush3.bf16.msra.mxu0 %v1609_v18  ;;  %1149 = vmatpush3.bf16.msra.mxu1 %v1609_v18 }
  0x7f   :  { %1126 = vmatprep.subr.bf16.mxu0 %v1421_v2  ;;  %1150 = vmatprep.subr.bf16.mxu1 %v1421_v2 }
  0x82   :  { %1128 = vmatpush3.bf16.msra.mxu0 %v1618_v24  ;;  %1152 = vmatpush3.bf16.msra.mxu1 %v1618_v24 }
  0x83   :  { %1129 = vmatprep.subr.bf16.mxu0 %v1421_v2  ;;  %1153 = vmatprep.subr.bf16.mxu1 %v1421_v2 }
  0x86   :  { %1131 = vmatpush3.bf16.msra.mxu0 %v1626_v19  ;;  %1155 = vmatpush3.bf16.msra.mxu1 %v1626_v19 }
  0x87   :  { %1156 = vmatprep.subr.bf16.mxu0 %v1421_v2  ;;  %1180 = vmatprep.subr.bf16.mxu1 %v1421_v2 }
  0x98   :  { %s1197_s21 = spop %1196 }
  0x99   :  { %v1638_v30 = vstv %s1197_s21 }
  0x9a   :  { %v227_v31 = vmul.f32 %v1638_v30, %v217_v22  ;;  %v228_v32 = vmul.f32 %v1638_v30, %v218_v27  ;;  %v229_v33 = vmul.f32 %v1638_v30, %v219_v28  ;;  %v230_v34 = vmul.f32 %v1638_v30, %v220_v29 }
  0x9b   :  { %v231_v40 = vmul.f32 %v1638_v30, %v221_v35  ;;  %v232_v51 = vmul.f32 %v1638_v30, %v222_v46  ;;  %v233_v61 = vmul.f32 %v1638_v30, %v223_v56  ;;  %v234_v9 = vmul.f32 %v1638_v30, %v224_v6 }
  0x9c   :  { %v1198_v37 = vround.rtne.f32 %v227_v31  ;;  %v1199_v38 = vround.rtne.f32 %v228_v32  ;;  %v1200_v39 = vround.rtne.f32 %v229_v33  ;;  %v1201_v45 = vround.rtne.f32 %v230_v34 }
  0x9d   :  { %v1202_v50 = vround.rtne.f32 %v231_v40  ;;  %v1203_v60 = vround.rtne.f32 %v232_v51  ;;  %v1204_v8 = vround.rtne.f32 %v233_v61  ;;  %v1205_v20 = vround.rtne.f32 %v234_v9  ;;  %v1711_v51 = vld [vmem:[#allocation10] ss:$0 sm:$0xff] }
  0x9e   :  { %v246_v42 = vadd.f32 %v1198_v37, %v1644_v36  ;;  %v247_v43 = vadd.f32 %v1199_v38, %v1644_v36  ;;  %v248_v44 = vadd.f32 %v1200_v39, %v1644_v36  ;;  %v249_v55 = vadd.f32 %v1201_v45, %v1644_v36 }
  0x9f   :  { %v250_v59 = vadd.f32 %v1202_v50, %v1644_v36  ;;  %v251_v7 = vadd.f32 %v1203_v60, %v1644_v36  ;;  %v252_v17 = vadd.f32 %v1204_v8, %v1644_v36  ;;  %v235_v26 = vmul.f32 %v1638_v30, %v225_v15 }
  0xa0   :  { %v255_v47 = vmax.f32 %v246_v42, 0.0  ;;  %v256_v49 = vmax.f32 %v247_v43, 0.0  ;;  %v257_v54 = vmax.f32 %v248_v44, 0.0  ;;  %v258_v5 = vmax.f32 %v249_v55, 0.0 }
  0xa1   :  { %v259_v14 = vmax.f32 %v250_v59, 0.0  ;;  %v260_v16 = vmax.f32 %v251_v7, 0.0  ;;  %v261_v22 = vmax.f32 %v252_v17, 0.0  ;;  %v253_v27 = vadd.f32 %v1205_v20, %v1644_v36 }
  0xa2   :  { %v264_v52 = vmin.f32 %v255_v47, 255.0  ;;  %v265_v53 = vmin.f32 %v256_v49, 255.0  ;;  %v266_v3 = vmin.f32 %v257_v54, 255.0  ;;  %v267_v12 = vmin.f32 %v258_v5, 255.0 }
  0xa3   :  { %v268_v25 = vmin.f32 %v259_v14, 255.0  ;;  %v269_v31 = vmin.f32 %v260_v16, 255.0  ;;  %v1206_v32 = vround.rtne.f32 %v235_v26  ;;  %v262_v33 = vmax.f32 %v253_v27, 0.0 }
  0xa4   :  { %v273_v57 = vsub.f32 %v264_v52, %v1644_v36  ;;  %v274_v1 = vsub.f32 %v265_v53, %v1644_v36  ;;  %v275_v11 = vsub.f32 %v266_v3, %v1644_v36  ;;  %v276_v23 = vsub.f32 %v267_v12, %v1644_v36 }
  0xa5   :  { %v277_v29 = vsub.f32 %v268_v25, %v1644_v36  ;;  %v278_v35 = vsub.f32 %v269_v31, %v1644_v36  ;;  %v270_v37 = vmin.f32 %v261_v22, 255.0  ;;  %v254_v38 = vadd.f32 %v1206_v32, %v1644_v36 }
  0xa6   :  { %v283_v63 = vmul.f32 %v273_v57, %v1542_v0  ;;  %v284_v10 = vmul.f32 %v274_v1, %v1542_v0  ;;  %v285_v21 = vmul.f32 %v275_v11, %v1542_v0  ;;  %v286_v28 = vmul.f32 %v276_v23, %v1542_v0 }
  0xa7   :  { %v287_v34 = vmul.f32 %v277_v29, %v1542_v0  ;;  %v288_v39 = vmul.f32 %v278_v35, %v1542_v0  ;;  %v279_v40 = vsub.f32 %v270_v37, %v1644_v36  ;;  %v271_v42 = vmin.f32 %v262_v33, 255.0 }
  0xa8   :  { %964 = vmatmul.mubr.f32.vlgmr.msra.gmra.mrb[0].mxu0 %v283_v63  ;;  %v263_v43 = vmax.f32 %v254_v38, 0.0 }
  0xa9   :  { %966 = vmatprep.mubr.msk.f32.mxu0 %vm1422_vm0, %v1423_v4  ;;  %1158 = vmatpush3.bf16.msra.mxu0 %v1566_v41  ;;  %v289_v44 = vmul.f32 %v279_v40, %v1542_v0  ;;  %v280_v45 = vsub.f32 %v271_v42, %v1644_v36 }
  0xaa   :  { %1159 = vmatprep.subr.bf16.mxu0 %v1421_v2  ;;  %v272_v46 = vmin.f32 %v263_v43, 255.0 }
  0xab   :  { %v290_v47 = vmul.f32 %v280_v45, %v1542_v0 }
  0xac   :  { %967 = vmatmul.mubr.f32.gmra.mrb[2].mxu0 %v284_v10  ;;  %v281_v49 = vsub.f32 %v272_v46, %v1644_v36 }
  0xad   :  { %969 = vmatprep.mubr.msk.f32.mxu0 %vm1422_vm0, %v1423_v4  ;;  %1161 = vmatpush3.bf16.msra.mxu0 %v1572_v48 }
  0xae   :  { %1162 = vmatprep.subr.bf16.mxu0 %v1421_v2  ;;  %v291_v50 = vmul.f32 %v281_v49, %v1542_v0 }
  0xb0   :  { %970 = vmatmul.mubr.f32.gmra.mrb[4].mxu0 %v285_v21 }
  0xb1   :  { %972 = vmatprep.mubr.msk.f32.mxu0 %vm1422_vm0, %v1423_v4  ;;  %1164 = vmatpush3.bf16.msra.mxu0 %v1580_v58 }
  0xb2   :  { %1165 = vmatprep.subr.bf16.mxu0 %v1421_v2 }
  0xb4   :  { %973 = vmatmul.mubr.f32.gmra.mrb[6].mxu0 %v286_v28 }
  0xb5   :  { %975 = vmatprep.mubr.msk.f32.mxu0 %vm1422_vm0, %v1423_v4  ;;  %1167 = vmatpush3.bf16.msra.mxu0 %v1586_v62 }
  0xb6   :  { %1168 = vmatprep.subr.bf16.mxu0 %v1421_v2 }
  0xb8   :  { %976 = vmatmul.mubr.f32.gmra.mrb[8].mxu0 %v287_v34 }
  0xb9   :  { %978 = vmatprep.mubr.msk.f32.mxu0 %vm1422_vm0, %v1423_v4  ;;  %1170 = vmatpush3.bf16.msra.mxu0 %v1600_v13 }
  0xba   :  { %1171 = vmatprep.subr.bf16.mxu0 %v1421_v2 }
  0xbc   :  { %979 = vmatmul.mubr.f32.gmra.mrb[10].mxu0 %v288_v39 }
  0xbd   :  { %981 = vmatprep.mubr.msk.f32.mxu0 %vm1422_vm0, %v1423_v4  ;;  %1173 = vmatpush3.bf16.msra.mxu0 %v1609_v18 }
  0xbe   :  { %1174 = vmatprep.subr.bf16.mxu0 %v1421_v2 }
  0xc0   :  { %982 = vmatmul.mubr.f32.gmra.mrb[12].mxu0 %v289_v44 }
  0xc1   :  { %984 = vmatprep.mubr.msk.f32.mxu0 %vm1422_vm0, %v1423_v4  ;;  %1176 = vmatpush3.bf16.msra.mxu0 %v1618_v24 }
  0xc2   :  { %1177 = vmatprep.subr.bf16.mxu0 %v1421_v2 }
  0xc4   :  { %985 = vmatmul.mubr.f32.gmra.mrb[14].mxu0 %v290_v47 }
  0xc5   :  { %987 = vmatprep.mubr.msk.f32.mxu0 %vm1422_vm0, %v1423_v4  ;;  %1179 = vmatpush3.bf16.msra.mxu0 %v1626_v19 }
  0xc8   :  { %988 = vmatmul.mubr.f32.gmra.mrb[16].mxu0 %v291_v50 }
  0xc9   :  { %1081 = vmatprep.mubr.msk.f32.mxu0 %vm1422_vm0, %v1423_v4 }
 0x17b   :  { %v364_v52 = vpop.f32.mrb[0].mxu0 }
 0x17c   :  { %v365_v53 = vadd.f32 %v1711_v51, %v364_v52  ;;  %v965_v54 = vpop.f32.mrb[1].mxu0 }
 0x17e   :  { %v408_v55 = vmul.f32 %v365_v53, %v1638_v30 }
 0x17f   :  { %v369_v56 = vpop.f32.mrb[2].mxu0 }
 0x180   :  { %v1207_v57 = vround.rtne.f32 %v408_v55  ;;  %v370_v59 = vadd.f32 %v1711_v51, %v369_v56  ;;  %v968_v60 = vpop.f32.mrb[3].mxu0 }
 0x182   :  { %v426_v61 = vadd.f32 %v1207_v57, %v1644_v36  ;;  %v409_v63 = vmul.f32 %v370_v59, %v1638_v30 }
 0x183   :  { %v374_v1 = vpop.f32.mrb[4].mxu0 }
 0x184   :  { %v435_v3 = vmax.f32 %v426_v61, 0.0  ;;  %v1208_v5 = vround.rtne.f32 %v409_v63  ;;  %v375_v6 = vadd.f32 %v1711_v51, %v374_v1  ;;  %v971_v7 = vpop.f32.mrb[5].mxu0 }
 0x186   :  { %v444_v8 = vmin.f32 %v435_v3, 255.0  ;;  %v427_v9 = vadd.f32 %v1208_v5, %v1644_v36  ;;  %v410_v10 = vmul.f32 %v375_v6, %v1638_v30 }
 0x187   :  { %v379_v11 = vpop.f32.mrb[6].mxu0 }
 0x188   :  { %v436_v12 = vmax.f32 %v427_v9, 0.0  ;;  %v1209_v14 = vround.rtne.f32 %v410_v10  ;;  %v380_v15 = vadd.f32 %v1711_v51, %v379_v11  ;;  %v974_v16 = vpop.f32.mrb[7].mxu0  ;;  %v453_v17 = vsub.f32 %v444_v8, %v1644_v36 }
 0x18a   :  { %v445_v20 = vmin.f32 %v436_v12, 255.0  ;;  %v428_v21 = vadd.f32 %v1209_v14, %v1644_v36  ;;  %v411_v23 = vmul.f32 %v380_v15, %v1638_v30  ;;  %v462_v25 = vmul.f32 %v453_v17, %v1542_v0 }
 0x18b   :  { %v384_v26 = vpop.f32.mrb[8].mxu0 }
 0x18c   :  { %v437_v22 = vmax.f32 %v428_v21, 0.0  ;;  %v1210_v27 = vround.rtne.f32 %v411_v23  ;;  %v385_v28 = vadd.f32 %v1711_v51, %v384_v26  ;;  %v977_v29 = vpop.f32.mrb[9].mxu0  ;;  %1023 = vmatmul.mubr.f32.vlgmr.msra.gmra.mrb[0].mxu1 %v462_v25  ;;  %v454_v31 = vsub.f32 %v445_v20, %v1644_v36 }
 0x18d   :  { %1025 = vmatprep.mubr.msk.f32.mxu1 %vm1422_vm0, %v1423_v4  ;;  %1188 = vmatpush3.bf16.msra.mxu1 %v1566_v41 }
 0x18e   :  { %v446_v32 = vmin.f32 %v437_v22, 255.0  ;;  %v429_v33 = vadd.f32 %v1210_v27, %v1644_v36  ;;  %v412_v34 = vmul.f32 %v385_v28, %v1638_v30  ;;  %v463_v35 = vmul.f32 %v454_v31, %v1542_v0  ;;  %1181 = vmatprep.subr.bf16.mxu1 %v1421_v2 }
 0x18f   :  { %v389_v37 = vpop.f32.mrb[10].mxu0 }
 0x190   :  { %v438_v38 = vmax.f32 %v429_v33, 0.0  ;;  %v1211_v39 = vround.rtne.f32 %v412_v34  ;;  %v390_v40 = vadd.f32 %v1711_v51, %v389_v37  ;;  %v980_v42 = vpop.f32.mrb[11].mxu0  ;;  %1026 = vmatmul.mubr.f32.gmra.mrb[2].mxu1 %v463_v35  ;;  %v455_v43 = vsub.f32 %v446_v32, %v1644_v36 }
 0x191   :  { %1028 = vmatprep.mubr.msk.f32.mxu1 %vm1422_vm0, %v1423_v4  ;;  %1189 = vmatpush3.bf16.msra.mxu1 %v1572_v48 }
 0x192   :  { %v447_v41 = vmin.f32 %v438_v38, 255.0  ;;  %v430_v44 = vadd.f32 %v1211_v39, %v1644_v36  ;;  %v413_v45 = vmul.f32 %v390_v40, %v1638_v30  ;;  %v464_v46 = vmul.f32 %v455_v43, %v1542_v0  ;;  %1182 = vmatprep.subr.bf16.mxu1 %v1421_v2 }
 0x193   :  { %v394_v47 = vpop.f32.mrb[12].mxu0 }
 0x194   :  { %v439_v49 = vmax.f32 %v430_v44, 0.0  ;;  %v1212_v50 = vround.rtne.f32 %v413_v45  ;;  %v395_v52 = vadd.f32 %v1711_v51, %v394_v47  ;;  %v983_v53 = vpop.f32.mrb[13].mxu0  ;;  %1029 = vmatmul.mubr.f32.gmra.mrb[4].mxu1 %v464_v46  ;;  %v456_v54 = vsub.f32 %v447_v41, %v1644_v36 }
 0x195   :  { %1031 = vmatprep.mubr.msk.f32.mxu1 %vm1422_vm0, %v1423_v4  ;;  %1190 = vmatpush3.bf16.msra.mxu1 %v1580_v58 }
 0x196   :  { %v448_v48 = vmin.f32 %v439_v49, 255.0  ;;  %v431_v55 = vadd.f32 %v1212_v50, %v1644_v36  ;;  %v414_v56 = vmul.f32 %v395_v52, %v1638_v30  ;;  %v465_v57 = vmul.f32 %v456_v54, %v1542_v0  ;;  %1183 = vmatprep.subr.bf16.mxu1 %v1421_v2 }
 0x197   :  { %v399_v59 = vpop.f32.mrb[14].mxu0 }
 0x198   :  { %v440_v60 = vmax.f32 %v431_v55, 0.0  ;;  %v1213_v61 = vround.rtne.f32 %v414_v56  ;;  %v400_v63 = vadd.f32 %v1711_v51, %v399_v59  ;;  %v986_v1 = vpop.f32.mrb[15].mxu0  ;;  %1032 = vmatmul.mubr.f32.gmra.mrb[6].mxu1 %v465_v57  ;;  %v457_v3 = vsub.f32 %v448_v48, %v1644_v36 }
 0x199   :  { %1034 = vmatprep.mubr.msk.f32.mxu1 %vm1422_vm0, %v1423_v4  ;;  %1191 = vmatpush3.bf16.msra.mxu1 %v1586_v62 }
 0x19a   :  { %v449_v58 = vmin.f32 %v440_v60, 255.0  ;;  %v432_v5 = vadd.f32 %v1213_v61, %v1644_v36  ;;  %v415_v6 = vmul.f32 %v400_v63, %v1638_v30  ;;  %v466_v7 = vmul.f32 %v457_v3, %v1542_v0  ;;  %1184 = vmatprep.subr.bf16.mxu1 %v1421_v2 }
 0x19b   :  { %v404_v8 = vpop.f32.mrb[16].mxu0 }
 0x19c   :  { %v441_v9 = vmax.f32 %v432_v5, 0.0  ;;  %v1214_v10 = vround.rtne.f32 %v415_v6  ;;  %v405_v11 = vadd.f32 %v1711_v51, %v404_v8  ;;  %v989_v12 = vpop.f32.mrb[17].mxu0  ;;  %1035 = vmatmul.mubr.f32.gmra.mrb[8].mxu1 %v466_v7  ;;  %v458_v14 = vsub.f32 %v449_v58, %v1644_v36 }
 0x19d   :  { %1037 = vmatprep.mubr.msk.f32.mxu1 %vm1422_vm0, %v1423_v4  ;;  %1192 = vmatpush3.bf16.msra.mxu1 %v1600_v13 }
 0x19e   :  { %v450_v62 = vmin.f32 %v441_v9, 255.0  ;;  %v433_v15 = vadd.f32 %v1214_v10, %v1644_v36  ;;  %v416_v16 = vmul.f32 %v405_v11, %v1638_v30  ;;  %v467_v17 = vmul.f32 %v458_v14, %v1542_v0  ;;  %1185 = vmatprep.subr.bf16.mxu1 %v1421_v2 }
 0x1a0   :  { %v442_v20 = vmax.f32 %v433_v15, 0.0  ;;  %v1215_v21 = vround.rtne.f32 %v416_v16  ;;  %1038 = vmatmul.mubr.f32.gmra.mrb[10].mxu1 %v467_v17  ;;  %v459_v23 = vsub.f32 %v450_v62, %v1644_v36 }
 0x1a1   :  { %1040 = vmatprep.mubr.msk.f32.mxu1 %vm1422_vm0, %v1423_v4  ;;  %1193 = vmatpush3.bf16.msra.mxu1 %v1609_v18 }
 0x1a2   :  { %v451_v13 = vmin.f32 %v442_v20, 255.0  ;;  %v434_v25 = vadd.f32 %v1215_v21, %v1644_v36  ;;  %v468_v26 = vmul.f32 %v459_v23, %v1542_v0  ;;  %1186 = vmatprep.subr.bf16.mxu1 %v1421_v2 }
 0x1a4   :  { %v443_v22 = vmax.f32 %v434_v25, 0.0  ;;  %1041 = vmatmul.mubr.f32.gmra.mrb[12].mxu1 %v468_v26  ;;  %v460_v27 = vsub.f32 %v451_v13, %v1644_v36 }
 0x1a5   :  { %1043 = vmatprep.mubr.msk.f32.mxu1 %vm1422_vm0, %v1423_v4  ;;  %1194 = vmatpush3.bf16.msra.mxu1 %v1618_v24 }
 0x1a6   :  { %v452_v28 = vmin.f32 %v443_v22, 255.0  ;;  %v469_v29 = vmul.f32 %v460_v27, %v1542_v0  ;;  %1187 = vmatprep.subr.bf16.mxu1 %v1421_v2 }
 0x1a8   :  { %1044 = vmatmul.mubr.f32.gmra.mrb[14].mxu1 %v469_v29  ;;  %v461_v18 = vsub.f32 %v452_v28, %v1644_v36 }
 0x1a9   :  { %1046 = vmatprep.mubr.msk.f32.mxu1 %vm1422_vm0, %v1423_v4  ;;  %1195 = vmatpush3.bf16.msra.mxu1 %v1626_v19 }
 0x1aa   :  { %v470_v31 = vmul.f32 %v461_v18, %v1542_v0 }
 0x1ac   :  { %1047 = vmatmul.mubr.f32.gmra.mrb[16].mxu1 %v470_v31 }
 0x1ad   :  { %1096 = vmatprep.mubr.msk.f32.mxu1 %vm1422_vm0, %v1423_v4 }
 0x25f   :  { %v537_v24 = vpop.f32.mrb[0].mxu1 }
 0x260   :  { %v538_v32 = vadd.f32 %v1711_v51, %v537_v24  ;;  %v1024_v33 = vpop.f32.mrb[1].mxu1 }
 0x262   :  { %v581_v34 = vmax.f32 %v538_v32, 0.0 }
 0x263   :  { %v542_v2 = vpop.f32.mrb[2].mxu1 }
 0x264   :  { %v590_v35 = vmul.f32 %v581_v34, %v1638_v30  ;;  %v543_v37 = vadd.f32 %v1711_v51, %v542_v2  ;;  %v1027_v38 = vpop.f32.mrb[3].mxu1 }
 0x266   :  { %v1216_v39 = vround.rtne.f32 %v590_v35  ;;  %v582_v40 = vmax.f32 %v543_v37, 0.0 }
 0x267   :  { %v547_v19 = vpop.f32.mrb[4].mxu1 }
 0x268   :  { %v608_v42 = vadd.f32 %v1216_v39, %v1644_v36  ;;  %v591_v43 = vmul.f32 %v582_v40, %v1638_v30  ;;  %v548_v41 = vadd.f32 %v1711_v51, %v547_v19  ;;  %v1030_v44 = vpop.f32.mrb[5].mxu1 }
 0x26a   :  { %v617_v45 = vmax.f32 %v608_v42, 0.0  ;;  %v1217_v46 = vround.rtne.f32 %v591_v43  ;;  %v583_v47 = vmax.f32 %v548_v41, 0.0 }
 0x26b   :  { %v552_v49 = vpop.f32.mrb[6].mxu1 }
 0x26c   :  { %v626_v50 = vmin.f32 %v617_v45, 255.0  ;;  %v609_v52 = vadd.f32 %v1217_v46, %v1644_v36  ;;  %v592_v53 = vmul.f32 %v583_v47, %v1638_v30  ;;  %v553_v54 = vadd.f32 %v1711_v51, %v552_v49  ;;  %v1033_v48 = vpop.f32.mrb[7].mxu1 }
 0x26e   :  { %v635_v55 = vsub.f32 %v626_v50, %v1644_v36  ;;  %v618_v56 = vmax.f32 %v609_v52, 0.0  ;;  %v1218_v57 = vround.rtne.f32 %v592_v53  ;;  %v584_v59 = vmax.f32 %v553_v54, 0.0 }
 0x26f   :  { %v557_v60 = vpop.f32.mrb[8].mxu1 }
 0x270   :  { %v644_v61 = vmul.f32 %v635_v55, %v1542_v0  ;;  %v627_v63 = vmin.f32 %v618_v56, 255.0  ;;  %v610_v1 = vadd.f32 %v1218_v57, %v1644_v36  ;;  %v593_v3 = vmul.f32 %v584_v59, %v1638_v30  ;;  %v1036_v58 = vpop.f32.mrb[9].mxu1 }
 0x271   :  { %v558_v5 = vadd.f32 %v1711_v51, %v557_v60 }
 0x272   :  { %v619_v6 = vmax.f32 %v610_v1, 0.0  ;;  %v1219_v7 = vround.rtne.f32 %v593_v3  ;;  %1082 = vmatmul.mubr.f32.vlgmr.msra.gmra.mrb[18].mxu0 %v644_v61  ;;  %v636_v8 = vsub.f32 %v627_v63, %v1644_v36 }
 0x273   :  { %v585_v9 = vmax.f32 %v558_v5, 0.0  ;;  %v562_v10 = vpop.f32.mrb[10].mxu1  ;;  %1084 = vmatprep.mubr.msk.f32.mxu0 %vm1422_vm0, %v1423_v4 }
 0x274   :  { %v628_v11 = vmin.f32 %v619_v6, 255.0  ;;  %v611_v12 = vadd.f32 %v1219_v7, %v1644_v36  ;;  %v563_v14 = vadd.f32 %v1711_v51, %v562_v10  ;;  %v1039_v62 = vpop.f32.mrb[11].mxu1  ;;  %v645_v15 = vmul.f32 %v636_v8, %v1542_v0 }
 0x275   :  { %v594_v16 = vmul.f32 %v585_v9, %v1638_v30 }
 0x276   :  { %v620_v17 = vmax.f32 %v611_v12, 0.0  ;;  %v586_v20 = vmax.f32 %v563_v14, 0.0  ;;  %1085 = vmatmul.mubr.f32.gmra.mrb[20].mxu0 %v645_v15  ;;  %v637_v21 = vsub.f32 %v628_v11, %v1644_v36 }
 0x277   :  { %v1220_v23 = vround.rtne.f32 %v594_v16  ;;  %v567_v13 = vpop.f32.mrb[12].mxu1  ;;  %1087 = vmatprep.mubr.msk.f32.mxu0 %vm1422_vm0, %v1423_v4 }
 0x278   :  { %v629_v25 = vmin.f32 %v620_v17, 255.0  ;;  %v595_v26 = vmul.f32 %v586_v20, %v1638_v30  ;;  %v568_v22 = vadd.f32 %v1711_v51, %v567_v13  ;;  %v1042_v27 = vpop.f32.mrb[13].mxu1  ;;  %v646_v28 = vmul.f32 %v637_v21, %v1542_v0 }
 0x279   :  { %v612_v29 = vadd.f32 %v1220_v23, %v1644_v36 }
 0x27a   :  { %v1221_v18 = vround.rtne.f32 %v595_v26  ;;  %v587_v31 = vmax.f32 %v568_v22, 0.0  ;;  %1088 = vmatmul.mubr.f32.gmra.mrb[22].mxu0 %v646_v28  ;;  %v638_v24 = vsub.f32 %v629_v25, %v1644_v36 }
 0x27b   :  { %v621_v32 = vmax.f32 %v612_v29, 0.0  ;;  %v572_v33 = vpop.f32.mrb[14].mxu1  ;;  %1090 = vmatprep.mubr.msk.f32.mxu0 %vm1422_vm0, %v1423_v4 }
 0x27c   :  { %v613_v34 = vadd.f32 %v1221_v18, %v1644_v36  ;;  %v596_v2 = vmul.f32 %v587_v31, %v1638_v30  ;;  %v573_v35 = vadd.f32 %v1711_v51, %v572_v33  ;;  %v1045_v37 = vpop.f32.mrb[15].mxu1  ;;  %v647_v38 = vmul.f32 %v638_v24, %v1542_v0 }
 0x27d   :  { %v630_v39 = vmin.f32 %v621_v32, 255.0 }
 0x27e   :  { %v622_v40 = vmax.f32 %v613_v34, 0.0  ;;  %v1222_v19 = vround.rtne.f32 %v596_v2  ;;  %v588_v42 = vmax.f32 %v573_v35, 0.0  ;;  %1091 = vmatmul.mubr.f32.gmra.mrb[24].mxu0 %v647_v38 }
 0x27f   :  { %v577_v43 = vpop.f32.mrb[16].mxu1  ;;  %1093 = vmatprep.mubr.msk.f32.mxu0 %vm1422_vm0, %v1423_v4  ;;  %v639_v41 = vsub.f32 %v630_v39, %v1644_v36 }
 0x280   :  { %v631_v44 = vmin.f32 %v622_v40, 255.0  ;;  %v614_v45 = vadd.f32 %v1222_v19, %v1644_v36  ;;  %v597_v46 = vmul.f32 %v588_v42, %v1638_v30  ;;  %v578_v47 = vadd.f32 %v1711_v51, %v577_v43  ;;  %v1048_v49 = vpop.f32.mrb[17].mxu1 }
 0x281   :  { %v648_v50 = vmul.f32 %v639_v41, %v1542_v0 }
 0x282   :  { %v640_v52 = vsub.f32 %v631_v44, %v1644_v36  ;;  %v623_v53 = vmax.f32 %v614_v45, 0.0  ;;  %v1223_v54 = vround.rtne.f32 %v597_v46  ;;  %v589_v48 = vmax.f32 %v578_v47, 0.0 }
 0x283   :  { %1094 = vmatmul.mubr.f32.gmra.mrb[26].mxu0 %v648_v50 }
 0x284   :  { %v649_v55 = vmul.f32 %v640_v52, %v1542_v0  ;;  %v632_v56 = vmin.f32 %v623_v53, 255.0  ;;  %v615_v57 = vadd.f32 %v1223_v54, %v1644_v36  ;;  %v598_v59 = vmul.f32 %v589_v48, %v1638_v30 }
 0x286   :  { %v624_v60 = vmax.f32 %v615_v57, 0.0  ;;  %v1224_v61 = vround.rtne.f32 %v598_v59  ;;  %1097 = vmatmul.mubr.f32.vlgmr.msra.gmra.mrb[18].mxu1 %v649_v55  ;;  %v641_v63 = vsub.f32 %v632_v56, %v1644_v36 }
 0x287   :  { %1099 = vmatprep.mubr.msk.f32.mxu1 %vm1422_vm0, %v1423_v4 }
 0x288   :  { %v633_v1 = vmin.f32 %v624_v60, 255.0  ;;  %v616_v3 = vadd.f32 %v1224_v61, %v1644_v36  ;;  %v650_v58 = vmul.f32 %v641_v63, %v1542_v0 }
 0x28a   :  { %v625_v5 = vmax.f32 %v616_v3, 0.0  ;;  %1100 = vmatmul.mubr.f32.gmra.mrb[20].mxu1 %v650_v58  ;;  %v642_v6 = vsub.f32 %v633_v1, %v1644_v36 }
 0x28b   :  { %1102 = vmatprep.mubr.msk.f32.mxu1 %vm1422_vm0, %v1423_v4 }
 0x28c   :  { %v634_v30 = vmin.f32 %v625_v5, 255.0  ;;  %v651_v7 = vmul.f32 %v642_v6, %v1542_v0 }
 0x28e   :  { %1103 = vmatmul.mubr.f32.gmra.mrb[22].mxu1 %v651_v7  ;;  %v643_v8 = vsub.f32 %v634_v30, %v1644_v36 }
 0x28f   :  { %1105 = vmatprep.mubr.msk.f32.mxu1 %vm1422_vm0, %v1423_v4 }
 0x290   :  { %v652_v9 = vmul.f32 %v643_v8, %v1542_v0 }
 0x292   :  { %1106 = vmatmul.mubr.f32.gmra.mrb[24].mxu1 %v652_v9 }
 0x345   :  { %v719_v10 = vpop.f32.mrb[18].mxu0 }
 0x346   :  { %v720_v11 = vadd.f32 %v1711_v51, %v719_v10  ;;  %v1083_v12 = vpop.f32.mrb[19].mxu0 }
 0x348   :  { %v847_v14 = vmul.f32 -1.442695, %v720_v11 }
 0x349   :  { %v724_v62 = vpop.f32.mrb[20].mxu0 }
 0x34a   :  { %1238 = vpow2.f32 %v847_v14  ;;  %v725_v15 = vadd.f32 %v1711_v51, %v724_v62  ;;  %v1086_v16 = vpop.f32.mrb[21].mxu0 }
 0x34c   :  { %v848_v17 = vmul.f32 -1.442695, %v725_v15 }
 0x34d   :  { %v729_v20 = vpop.f32.mrb[22].mxu0 }
 0x34e   :  { %1240 = vpow2.f32 %v848_v17  ;;  %v730_v36 = vadd.f32 %v1711_v51, %v729_v20  ;;  %v1089_v21 = vpop.f32.mrb[23].mxu0 }
 0x350   :  { %v849_v4 = vmul.f32 -1.442695, %v730_v36 }
 0x351   :  { %v734_v23 = vpop.f32.mrb[24].mxu0 }
 0x352   :  { %1242 = vpow2.f32 %v849_v4  ;;  %v735_v0 = vadd.f32 %v1711_v51, %v734_v23  ;;  %v1092_v13 = vpop.f32.mrb[25].mxu0 }
 0x354   :  { %v1239_v25 = vpop.eup %1238  ;;  %v850_v26 = vmul.f32 -1.442695, %v735_v0 }
 0x355   :  { %v790_v22 = vadd.f32 1.0, %v1239_v25 }
 0x356   :  { %1244 = vpow2.f32 %v850_v26  ;;  %v739_v27 = vpop.f32.mrb[26].mxu0 }
 0x357   :  { %1246 = vrcp.f32 %v790_v22  ;;  %v740_v28 = vadd.f32 %v1711_v51, %v739_v27  ;;  %v1095_v29 = vpop.f32.mrb[27].mxu0 }
 0x358   :  { %v1241_v18 = vpop.eup %1240 }
 0x359   :  { %v791_v31 = vadd.f32 1.0, %v1241_v18  ;;  %v851_v24 = vmul.f32 -1.442695, %v740_v28  ;;  %v744_v32 = vpop.f32.mrb[18].mxu1 }
 0x35a   :  { %v745_v33 = vadd.f32 %v1711_v51, %v744_v32  ;;  %v1098_v34 = vpop.f32.mrb[19].mxu1 }
 0x35b   :  { %1248 = vrcp.f32 %v791_v31 }
 0x35c   :  { %v1243_v2 = vpop.eup %1242  ;;  %1250 = vpow2.f32 %v851_v24  ;;  %v852_v35 = vmul.f32 -1.442695, %v745_v33 }
 0x35d   :  { %v792_v37 = vadd.f32 1.0, %v1243_v2  ;;  %v749_v38 = vpop.f32.mrb[20].mxu1 }
 0x35e   :  { %1252 = vpow2.f32 %v852_v35  ;;  %v750_v39 = vadd.f32 %v1711_v51, %v749_v38  ;;  %v1101_v40 = vpop.f32.mrb[21].mxu1 }
 0x35f   :  { %1254 = vrcp.f32 %v792_v37 }
 0x360   :  { %v1245_v19 = vpop.eup %1244  ;;  %v853_v42 = vmul.f32 -1.442695, %v750_v39 }
 0x361   :  { %v1247_v43 = vpop.eup %1246  ;;  %v793_v41 = vadd.f32 1.0, %v1245_v19  ;;  %v754_v44 = vpop.f32.mrb[22].mxu1 }
 0x362   :  { %817 = vst [vmem:[#allocation14] sm:$0xff] %v1247_v43  ;;  %1256 = vpow2.f32 %v853_v42  ;;  %v755_v45 = vadd.f32 %v1711_v51, %v754_v44  ;;  %v1104_v46 = vpop.f32.mrb[23].mxu1 }
 0x363   :  { %1258 = vrcp.f32 %v793_v41 }
 0x364   :  { %v854_v47 = vmul.f32 -1.442695, %v755_v45 }
 0x365   :  { %v1249_v49 = vpop.eup %1248  ;;  %v759_v50 = vpop.f32.mrb[24].mxu1 }
 0x366   :  { %v1251_v52 = vpop.eup %1250  ;;  %818 = vst [vmem:[#allocation14 + $0x8] sm:$0xff] %v1249_v49  ;;  %1260 = vpow2.f32 %v854_v47  ;;  %v760_v53 = vadd.f32 %v1711_v51, %v759_v50  ;;  %v1107_v54 = vpop.f32.mrb[25].mxu1 }
 0x367   :  { %v794_v48 = vadd.f32 1.0, %v1251_v52 }
 0x368   :  { %v1253_v55 = vpop.eup %1252  ;;  %v855_v56 = vmul.f32 -1.442695, %v760_v53 }
 0x369   :  { %v1255_v57 = vpop.eup %1254  ;;  %1262 = vrcp.f32 %v794_v48  ;;  %v795_v59 = vadd.f32 1.0, %v1253_v55 }
 0x36a   :  { %819 = vst [vmem:[#allocation14 + $0x10] sm:$0xff] %v1255_v57  ;;  %1264 = vpow2.f32 %v855_v56 }
 0x36b   :  { %1266 = vrcp.f32 %v795_v59 }
 0x36c   :  { %v1257_v60 = vpop.eup %1256 }
 0x36d   :  { %v1259_v61 = vpop.eup %1258  ;;  %v796_v63 = vadd.f32 1.0, %v1257_v60 }
 0x36e   :  { %820 = vst [vmem:[#allocation14 + $0x18] sm:$0xff] %v1259_v61 }
 0x36f   :  { %1268 = vrcp.f32 %v796_v63 }
 0x370   :  { %v1261_v1 = vpop.eup %1260 }
 0x371   :  { %v797_v3 = vadd.f32 1.0, %v1261_v1 }
 0x373   :  { %v1263_v58 = vpop.eup %1262  ;;  %1270 = vrcp.f32 %v797_v3 }
 0x374   :  { %v1265_v51 = vpop.eup %1264  ;;  %821 = vst [vmem:[#allocation14 + $0x20] sm:$0xff] %v1263_v58 }
 0x375   :  { %v1267_v5 = vpop.eup %1266  ;;  %v798_v6 = vadd.f32 1.0, %v1265_v51 }
 0x376   :  { %822 = vst [vmem:[#allocation14 + $0x28] sm:$0xff] %v1267_v5 }
 0x377   :  { %1272 = vrcp.f32 %v798_v6 }
 0x379   :  { %v1269_v30 = vpop.eup %1268 }
 0x37a   :  { %823 = vst [vmem:[#allocation14 + $0x30] sm:$0xff] %v1269_v30 }
 0x37d   :  { %v1271_v7 = vpop.eup %1270 }
 0x37e   :  { %824 = vst [vmem:[#allocation14 + $0x38] sm:$0xff] %v1271_v7 }
 0x381   :  { %v1273_v8 = vpop.eup %1272 }
 0x382   :  { %825 = vst [vmem:[#allocation14 + $0x40] sm:$0xff] %v1273_v8 }
 0x383   :  { %1395 = shalt.err (!%p1392_p2)
}
 0x384   :  { %s1396_s25 = scalar_lea.hbm %s1881_s7, 1152 }
 0x385   :  { %p1397_p3 = scmp.ne.s32.totalorder %s1881_s7, %s1396_s25  ;;  %p1400_p4 = scmp.lt.u32.totalorder %s1396_s25, %s1881_s7 }
 0x387   :  { %p1402_p5 = pnand %p1400_p4, %p1397_p3 }
 0x389   :  { %1405 = shalt.err (!%p1402_p5)
}
 0x38a   :  { %837 = dma.vmem_to_hbm [thread:$0]  %s832_s22, 1152, %s1881_s7, [#allocation7], %s1416_s13, %s1416_s13, %s1417_s14  }
 0x38b   :  { %1412 = dma.done.wait [#allocation7], 1152  }
 0x38c   :  { %1413 = vsyncadd [#allocation7], 4294966144 }
 0x38d   :  { %841 = vsyncpa [#allocation6], 1 }
 0x38e   :  { %842 = vsyncpa [#allocation9], 1 }
 0x38f   :  { %843 = vsyncpa [#allocation12], 1 }
 0x390   :  { %844 = vsyncpa [#allocation7], 1 }

</bundles_post_ra>
